<compile_context>
chip_gen: v7x
topology: tpu7x:2x2x1
jax: 0.10.0
libtpu: 0.0.40
codegen_flags: <defaults>
</compile_context>

<pallas_src>
import functools
import math

import jax
import jax.numpy as jnp
from jax.experimental import pallas as pl
from jax.experimental.pallas import tpu as pltpu


def _gated_conv_kernel(x_ref, w_ref, b_ref, o_ref, *, kh_size, kw_size, th, wo,
                       c_out):
    """Fused im2col + matmul + bias + gating for one (image, row-tile).

    x_ref: (Hp_pad, Wp, C_in)       bf16  padded image (resident across row tiles)
    w_ref: (KH, KW, 3*C_out, C_in)  bf16  conv weight
    b_ref: (3*C_out, 1)             f32   conv bias
    o_ref: (C_out, TM)              f32   gated output, TM = th*wo (lane-dense)
    """
    c_in = x_ref.shape[-1]
    tm = th * wo
    r = pl.program_id(1)
    row0 = pl.multiple_of(r * th, th)

    # Bias-initialised f32 accumulator; lanes are output pixels (TM of them).
    acc = jnp.broadcast_to(b_ref[...], (3 * c_out, tm))

    # Fused im2col: unrolled (kh, kw) loop of small MXU GEMMs, f32 accumulate.
    for kh in range(kh_size):
        for kw in range(kw_size):
            patch = x_ref[pl.ds(row0 + kh, th), pl.ds(kw, wo), :]  # (th, wo, C_in)
            patch = patch.reshape(tm, c_in)                        # (TM, C_in)
            # (3*C_out, C_in) x (TM, C_in)^T -> (3*C_out, TM)  (lane-dense result)
            acc = acc + jax.lax.dot_general(
                w_ref[kh, kw], patch,
                dimension_numbers=(((1,), (1,)), ((), ())),
                preferred_element_type=jnp.float32)

    a = acc[:c_out, :]
    g = acc[c_out:2 * c_out, :]
    c = acc[2 * c_out:, :]
    o_ref[...] = (a + g * jax.nn.sigmoid(c)).astype(o_ref.dtype)


def gated_conv2d(x_nchw, weight, bias, *, padding, target_tm=512):
    """GatedConv2d forward: conv(x) -> chunk(3, dim=1) -> a + b*sigmoid(c)."""
    N, C_in, H, W = x_nchw.shape
    O3, _, KH, KW = weight.shape
    C_out = O3 // 3

    Hp, Wp = H + 2 * padding, W + 2 * padding
    Ho, Wo = Hp - KH + 1, Wp - KW + 1

    # Pick a row tile `th` so TM = th*Wo is a multiple of 128 (lane-dense
    # output stores) and ~target_tm lanes per grid step.
    th0 = 128 // math.gcd(Wo, 128)                 # min rows for lane density
    n_units = pl.cdiv(Ho, th0)                     # Ho in units of th0
    units_per_step = max(1, min(n_units, target_tm // (th0 * Wo)))
    th = th0 * units_per_step
    R = pl.cdiv(n_units, units_per_step)           # row tiles per image
    ho_pad = R * th
    TM = th * Wo

    # ---- layout glue only (no im2col materialisation) ----
    x = jnp.transpose(x_nchw, (0, 2, 3, 1))        # NHWC
    xp = jnp.pad(x, ((0, 0),
                     (padding, padding + (ho_pad - Ho)),
                     (padding, padding),
                     (0, 0))).astype(jnp.bfloat16)  # (N, ho_pad+KH-1, Wp, C_in)

    # PyTorch (3*C_out, C_in, KH, KW) -> (KH, KW, 3*C_out, C_in), bf16.
    w = jnp.transpose(weight, (2, 3, 0, 1)).astype(jnp.bfloat16)
    b = bias.reshape(3 * C_out, 1).astype(jnp.float32)

    kernel = functools.partial(_gated_conv_kernel, kh_size=KH, kw_size=KW,
                               th=th, wo=Wo, c_out=C_out)

    out = pl.pallas_call(
        kernel,
        out_shape=jax.ShapeDtypeStruct((N, C_out, R * TM), jnp.float32),
        grid_spec=pltpu.PrefetchScalarGridSpec(
            num_scalar_prefetch=0,
            grid=(N, R),
            in_specs=[
                # Whole padded image per batch element; the block index is
                # invariant over the row-tile axis so it is DMA'd once per n.
                # TODO(synk): for very large images switch to pl.Element halo
                # row blocks (th+KH-1 rows per step) to bound VMEM on v7x.
                pl.BlockSpec((None, ho_pad + KH - 1, Wp, C_in),
                             lambda n, r: (n, 0, 0, 0)),
                pl.BlockSpec((KH, KW, 3 * C_out, C_in),
                             lambda n, r: (0, 0, 0, 0)),
                pl.BlockSpec((3 * C_out, 1), lambda n, r: (0, 0)),
            ],
            out_specs=pl.BlockSpec((None, C_out, TM), lambda n, r: (n, 0, r)),
        ),
        compiler_params=pltpu.CompilerParams(
            dimension_semantics=("parallel", "parallel"),
            vmem_limit_bytes=48 * 1024 * 1024),
    )(xp, w, b)

    # Channel-major output is already NCHW once reshaped; drop padded rows.
    out = out[:, :, :Ho * Wo].reshape(N, C_out, Ho, Wo)
    return out


if __name__ == "__main__":
    # Module config: GatedConv2d(in_channels=4, out_channels=4, kernel_size=3, padding=1)
    in_channels, out_channels, kernel_size, padding = 4, 4, 3, 1
    N, H, W = 2, 16, 16

    key = jax.random.PRNGKey(0)
    kx, kw, kb = jax.random.split(key, 3)

    x = jax.random.normal(kx, (N, in_channels, H, W), dtype=jnp.float32)

    # Deterministic params (PyTorch-like uniform(-1/sqrt(fan_in), 1/sqrt(fan_in)))
    fan_in = in_channels * kernel_size * kernel_size
    bound = 1.0 / (fan_in ** 0.5)
    weight = jax.random.uniform(
        kw, (out_channels * 3, in_channels, kernel_size, kernel_size),
        minval=-bound, maxval=bound, dtype=jnp.float32)
    bias = jax.random.uniform(
        kb, (out_channels * 3,), minval=-bound, maxval=bound, dtype=jnp.float32)

    fwd = jax.jit(gated_conv2d, static_argnames=("padding", "target_tm"))
    y = fwd(x, weight, bias, padding=padding)
    jax.block_until_ready(y)

    # Pure-JAX f32 reference (lax conv) to validate semantics.
    h_ref = jax.lax.conv_general_dilated(
        x, weight, window_strides=(1, 1),
        padding=((padding, padding), (padding, padding)),
        dimension_numbers=("NCHW", "OIHW", "NCHW"))
    h_ref = h_ref + bias[None, :, None, None]
    a_r, b_r, c_r = jnp.split(h_ref, 3, axis=1)
    y_ref = a_r + b_r * jax.nn.sigmoid(c_r)

    assert y.shape == (N, out_channels, H, W), y.shape
    # bf16 MXU operands (f32 accumulation) -> looser tolerance than pure f32.
    assert jnp.allclose(y, y_ref, atol=5e-2, rtol=5e-2), \
        float(jnp.max(jnp.abs(y - y_ref)))

    print("KERNEL_OK")
</pallas_src>

<mosaic_0001>
module attributes {stable_mosaic.version = 11 : i64} {
  func.func @_gated_conv_kernel(%arg0: i32, %arg1: i32, %arg2: memref<1x18x18x4xbf16, #tpu.memory_space<vmem>>, %arg3: memref<3x3x12x4xbf16, #tpu.memory_space<vmem>>, %arg4: memref<12x1xf32, #tpu.memory_space<vmem>>, %arg5: memref<1x4x256xf32, #tpu.memory_space<vmem>>) attributes {dimension_semantics = [#tpu.dimension_semantics<parallel>, #tpu.dimension_semantics<parallel>], iteration_bounds = array<i64: 2, 1>, scalar_prefetch = 0 : i64, scratch_operands = 0 : i64, tpu.core_type = #tpu.core_type<tc>, window_params = [{transform_indices = @transform_0, window_bounds = array<i64: 1, 18, 18, 4>}, {pipeline_mode = #tpu.pipeline_mode<synchronous>, transform_indices = @transform_1, window_bounds = array<i64: 3, 3, 12, 4>}, {pipeline_mode = #tpu.pipeline_mode<synchronous>, transform_indices = @transform_2, window_bounds = array<i64: 12, 1>}, {transform_indices = @transform_3, window_bounds = array<i64: 1, 4, 256>}]} {
    %c16_i32 = arith.constant 16 : i32
    %0 = arith.muli %arg1, %c16_i32 : i32
    %1 = tpu.assume_multiple %0, 16 : i32
    %c0 = arith.constant 0 : index
    %c0_0 = arith.constant 0 : index
    %2 = vector.load %arg4[%c0, %c0_0] : memref<12x1xf32, #tpu.memory_space<vmem>>, vector<12x1xf32>
    %3 = vector.shape_cast %2 : vector<12x1xf32> to vector<12x1xf32>
    %4 = vector.broadcast %3 : vector<12x1xf32> to vector<12x256xf32>
    %c0_i32 = arith.constant 0 : i32
    %5 = arith.addi %1, %c0_i32 : i32
    %c0_1 = arith.constant 0 : index
    %6 = arith.index_cast %5 : i32 to index
    %c0_2 = arith.constant 0 : index
    %c0_3 = arith.constant 0 : index
    %7 = vector.load %arg2[%c0_1, %6, %c0_2, %c0_3] : memref<1x18x18x4xbf16, #tpu.memory_space<vmem>>, vector<1x16x16x4xbf16>
    %8 = vector.shape_cast %7 : vector<1x16x16x4xbf16> to vector<16x16x4xbf16>
    %9 = vector.shape_cast %8 : vector<16x16x4xbf16> to vector<256x4xbf16>
    %c0_4 = arith.constant 0 : index
    %c0_5 = arith.constant 0 : index
    %c0_6 = arith.constant 0 : index
    %c0_7 = arith.constant 0 : index
    %10 = vector.load %arg3[%c0_4, %c0_5, %c0_6, %c0_7] : memref<3x3x12x4xbf16, #tpu.memory_space<vmem>>, vector<1x1x12x4xbf16>
    %11 = vector.shape_cast %10 : vector<1x1x12x4xbf16> to vector<12x4xbf16>
    %cst = arith.constant dense<0.000000e+00> : vector<12x256xf32>
    %12 = tpu.matmul %11, %9, %cst {dimension_numbers = #tpu.dot_dimension_numbers<[1], [1], [0], [0], [0, 0, 1, 0], [], []>} : vector<12x4xbf16>, vector<256x4xbf16>, vector<12x256xf32> -> vector<12x256xf32>
    %13 = arith.addf %4, %12 : vector<12x256xf32>
    %c0_i32_8 = arith.constant 0 : i32
    %14 = arith.addi %1, %c0_i32_8 : i32
    %c0_9 = arith.constant 0 : index
    %15 = arith.index_cast %14 : i32 to index
    %c1 = arith.constant 1 : index
    %c0_10 = arith.constant 0 : index
    %16 = vector.load %arg2[%c0_9, %15, %c1, %c0_10] : memref<1x18x18x4xbf16, #tpu.memory_space<vmem>>, vector<1x16x16x4xbf16>
    %17 = vector.shape_cast %16 : vector<1x16x16x4xbf16> to vector<16x16x4xbf16>
    %18 = vector.shape_cast %17 : vector<16x16x4xbf16> to vector<256x4xbf16>
    %c0_11 = arith.constant 0 : index
    %c1_12 = arith.constant 1 : index
    %c0_13 = arith.constant 0 : index
    %c0_14 = arith.constant 0 : index
    %19 = vector.load %arg3[%c0_11, %c1_12, %c0_13, %c0_14] : memref<3x3x12x4xbf16, #tpu.memory_space<vmem>>, vector<1x1x12x4xbf16>
    %20 = vector.shape_cast %19 : vector<1x1x12x4xbf16> to vector<12x4xbf16>
    %cst_15 = arith.constant dense<0.000000e+00> : vector<12x256xf32>
    %21 = tpu.matmul %20, %18, %cst_15 {dimension_numbers = #tpu.dot_dimension_numbers<[1], [1], [0], [0], [0, 0, 1, 0], [], []>} : vector<12x4xbf16>, vector<256x4xbf16>, vector<12x256xf32> -> vector<12x256xf32>
    %22 = arith.addf %13, %21 : vector<12x256xf32>
    %c0_i32_16 = arith.constant 0 : i32
    %23 = arith.addi %1, %c0_i32_16 : i32
    %c0_17 = arith.constant 0 : index
    %24 = arith.index_cast %23 : i32 to index
    %c2 = arith.constant 2 : index
    %c0_18 = arith.constant 0 : index
    %25 = vector.load %arg2[%c0_17, %24, %c2, %c0_18] : memref<1x18x18x4xbf16, #tpu.memory_space<vmem>>, vector<1x16x16x4xbf16>
    %26 = vector.shape_cast %25 : vector<1x16x16x4xbf16> to vector<16x16x4xbf16>
    %27 = vector.shape_cast %26 : vector<16x16x4xbf16> to vector<256x4xbf16>
    %c0_19 = arith.constant 0 : index
    %c2_20 = arith.constant 2 : index
    %c0_21 = arith.constant 0 : index
    %c0_22 = arith.constant 0 : index
    %28 = vector.load %arg3[%c0_19, %c2_20, %c0_21, %c0_22] : memref<3x3x12x4xbf16, #tpu.memory_space<vmem>>, vector<1x1x12x4xbf16>
    %29 = vector.shape_cast %28 : vector<1x1x12x4xbf16> to vector<12x4xbf16>
    %cst_23 = arith.constant dense<0.000000e+00> : vector<12x256xf32>
    %30 = tpu.matmul %29, %27, %cst_23 {dimension_numbers = #tpu.dot_dimension_numbers<[1], [1], [0], [0], [0, 0, 1, 0], [], []>} : vector<12x4xbf16>, vector<256x4xbf16>, vector<12x256xf32> -> vector<12x256xf32>
    %31 = arith.addf %22, %30 : vector<12x256xf32>
    %c1_i32 = arith.constant 1 : i32
    %32 = arith.addi %1, %c1_i32 : i32
    %c0_24 = arith.constant 0 : index
    %33 = arith.index_cast %32 : i32 to index
    %c0_25 = arith.constant 0 : index
    %c0_26 = arith.constant 0 : index
    %34 = vector.load %arg2[%c0_24, %33, %c0_25, %c0_26] : memref<1x18x18x4xbf16, #tpu.memory_space<vmem>>, vector<1x16x16x4xbf16>
    %35 = vector.shape_cast %34 : vector<1x16x16x4xbf16> to vector<16x16x4xbf16>
    %36 = vector.shape_cast %35 : vector<16x16x4xbf16> to vector<256x4xbf16>
    %c1_27 = arith.constant 1 : index
    %c0_28 = arith.constant 0 : index
    %c0_29 = arith.constant 0 : index
    %c0_30 = arith.constant 0 : index
    %37 = vector.load %arg3[%c1_27, %c0_28, %c0_29, %c0_30] : memref<3x3x12x4xbf16, #tpu.memory_space<vmem>>, vector<1x1x12x4xbf16>
    %38 = vector.shape_cast %37 : vector<1x1x12x4xbf16> to vector<12x4xbf16>
    %cst_31 = arith.constant dense<0.000000e+00> : vector<12x256xf32>
    %39 = tpu.matmul %38, %36, %cst_31 {dimension_numbers = #tpu.dot_dimension_numbers<[1], [1], [0], [0], [0, 0, 1, 0], [], []>} : vector<12x4xbf16>, vector<256x4xbf16>, vector<12x256xf32> -> vector<12x256xf32>
    %40 = arith.addf %31, %39 : vector<12x256xf32>
    %c1_i32_32 = arith.constant 1 : i32
    %41 = arith.addi %1, %c1_i32_32 : i32
    %c0_33 = arith.constant 0 : index
    %42 = arith.index_cast %41 : i32 to index
    %c1_34 = arith.constant 1 : index
    %c0_35 = arith.constant 0 : index
    %43 = vector.load %arg2[%c0_33, %42, %c1_34, %c0_35] : memref<1x18x18x4xbf16, #tpu.memory_space<vmem>>, vector<1x16x16x4xbf16>
    %44 = vector.shape_cast %43 : vector<1x16x16x4xbf16> to vector<16x16x4xbf16>
    %45 = vector.shape_cast %44 : vector<16x16x4xbf16> to vector<256x4xbf16>
    %c1_36 = arith.constant 1 : index
    %c1_37 = arith.constant 1 : index
    %c0_38 = arith.constant 0 : index
    %c0_39 = arith.constant 0 : index
    %46 = vector.load %arg3[%c1_36, %c1_37, %c0_38, %c0_39] : memref<3x3x12x4xbf16, #tpu.memory_space<vmem>>, vector<1x1x12x4xbf16>
    %47 = vector.shape_cast %46 : vector<1x1x12x4xbf16> to vector<12x4xbf16>
    %cst_40 = arith.constant dense<0.000000e+00> : vector<12x256xf32>
    %48 = tpu.matmul %47, %45, %cst_40 {dimension_numbers = #tpu.dot_dimension_numbers<[1], [1], [0], [0], [0, 0, 1, 0], [], []>} : vector<12x4xbf16>, vector<256x4xbf16>, vector<12x256xf32> -> vector<12x256xf32>
    %49 = arith.addf %40, %48 : vector<12x256xf32>
    %c1_i32_41 = arith.constant 1 : i32
    %50 = arith.addi %1, %c1_i32_41 : i32
    %c0_42 = arith.constant 0 : index
    %51 = arith.index_cast %50 : i32 to index
    %c2_43 = arith.constant 2 : index
    %c0_44 = arith.constant 0 : index
    %52 = vector.load %arg2[%c0_42, %51, %c2_43, %c0_44] : memref<1x18x18x4xbf16, #tpu.memory_space<vmem>>, vector<1x16x16x4xbf16>
    %53 = vector.shape_cast %52 : vector<1x16x16x4xbf16> to vector<16x16x4xbf16>
    %54 = vector.shape_cast %53 : vector<16x16x4xbf16> to vector<256x4xbf16>
    %c1_45 = arith.constant 1 : index
    %c2_46 = arith.constant 2 : index
    %c0_47 = arith.constant 0 : index
    %c0_48 = arith.constant 0 : index
    %55 = vector.load %arg3[%c1_45, %c2_46, %c0_47, %c0_48] : memref<3x3x12x4xbf16, #tpu.memory_space<vmem>>, vector<1x1x12x4xbf16>
    %56 = vector.shape_cast %55 : vector<1x1x12x4xbf16> to vector<12x4xbf16>
    %cst_49 = arith.constant dense<0.000000e+00> : vector<12x256xf32>
    %57 = tpu.matmul %56, %54, %cst_49 {dimension_numbers = #tpu.dot_dimension_numbers<[1], [1], [0], [0], [0, 0, 1, 0], [], []>} : vector<12x4xbf16>, vector<256x4xbf16>, vector<12x256xf32> -> vector<12x256xf32>
    %58 = arith.addf %49, %57 : vector<12x256xf32>
    %c2_i32 = arith.constant 2 : i32
    %59 = arith.addi %1, %c2_i32 : i32
    %c0_50 = arith.constant 0 : index
    %60 = arith.index_cast %59 : i32 to index
    %c0_51 = arith.constant 0 : index
    %c0_52 = arith.constant 0 : index
    %61 = vector.load %arg2[%c0_50, %60, %c0_51, %c0_52] : memref<1x18x18x4xbf16, #tpu.memory_space<vmem>>, vector<1x16x16x4xbf16>
    %62 = vector.shape_cast %61 : vector<1x16x16x4xbf16> to vector<16x16x4xbf16>
    %63 = vector.shape_cast %62 : vector<16x16x4xbf16> to vector<256x4xbf16>
    %c2_53 = arith.constant 2 : index
    %c0_54 = arith.constant 0 : index
    %c0_55 = arith.constant 0 : index
    %c0_56 = arith.constant 0 : index
    %64 = vector.load %arg3[%c2_53, %c0_54, %c0_55, %c0_56] : memref<3x3x12x4xbf16, #tpu.memory_space<vmem>>, vector<1x1x12x4xbf16>
    %65 = vector.shape_cast %64 : vector<1x1x12x4xbf16> to vector<12x4xbf16>
    %cst_57 = arith.constant dense<0.000000e+00> : vector<12x256xf32>
    %66 = tpu.matmul %65, %63, %cst_57 {dimension_numbers = #tpu.dot_dimension_numbers<[1], [1], [0], [0], [0, 0, 1, 0], [], []>} : vector<12x4xbf16>, vector<256x4xbf16>, vector<12x256xf32> -> vector<12x256xf32>
    %67 = arith.addf %58, %66 : vector<12x256xf32>
    %c2_i32_58 = arith.constant 2 : i32
    %68 = arith.addi %1, %c2_i32_58 : i32
    %c0_59 = arith.constant 0 : index
    %69 = arith.index_cast %68 : i32 to index
    %c1_60 = arith.constant 1 : index
    %c0_61 = arith.constant 0 : index
    %70 = vector.load %arg2[%c0_59, %69, %c1_60, %c0_61] : memref<1x18x18x4xbf16, #tpu.memory_space<vmem>>, vector<1x16x16x4xbf16>
    %71 = vector.shape_cast %70 : vector<1x16x16x4xbf16> to vector<16x16x4xbf16>
    %72 = vector.shape_cast %71 : vector<16x16x4xbf16> to vector<256x4xbf16>
    %c2_62 = arith.constant 2 : index
    %c1_63 = arith.constant 1 : index
    %c0_64 = arith.constant 0 : index
    %c0_65 = arith.constant 0 : index
    %73 = vector.load %arg3[%c2_62, %c1_63, %c0_64, %c0_65] : memref<3x3x12x4xbf16, #tpu.memory_space<vmem>>, vector<1x1x12x4xbf16>
    %74 = vector.shape_cast %73 : vector<1x1x12x4xbf16> to vector<12x4xbf16>
    %cst_66 = arith.constant dense<0.000000e+00> : vector<12x256xf32>
    %75 = tpu.matmul %74, %72, %cst_66 {dimension_numbers = #tpu.dot_dimension_numbers<[1], [1], [0], [0], [0, 0, 1, 0], [], []>} : vector<12x4xbf16>, vector<256x4xbf16>, vector<12x256xf32> -> vector<12x256xf32>
    %76 = arith.addf %67, %75 : vector<12x256xf32>
    %c2_i32_67 = arith.constant 2 : i32
    %77 = arith.addi %1, %c2_i32_67 : i32
    %c0_68 = arith.constant 0 : index
    %78 = arith.index_cast %77 : i32 to index
    %c2_69 = arith.constant 2 : index
    %c0_70 = arith.constant 0 : index
    %79 = vector.load %arg2[%c0_68, %78, %c2_69, %c0_70] : memref<1x18x18x4xbf16, #tpu.memory_space<vmem>>, vector<1x16x16x4xbf16>
    %80 = vector.shape_cast %79 : vector<1x16x16x4xbf16> to vector<16x16x4xbf16>
    %81 = vector.shape_cast %80 : vector<16x16x4xbf16> to vector<256x4xbf16>
    %c2_71 = arith.constant 2 : index
    %c2_72 = arith.constant 2 : index
    %c0_73 = arith.constant 0 : index
    %c0_74 = arith.constant 0 : index
    %82 = vector.load %arg3[%c2_71, %c2_72, %c0_73, %c0_74] : memref<3x3x12x4xbf16, #tpu.memory_space<vmem>>, vector<1x1x12x4xbf16>
    %83 = vector.shape_cast %82 : vector<1x1x12x4xbf16> to vector<12x4xbf16>
    %cst_75 = arith.constant dense<0.000000e+00> : vector<12x256xf32>
    %84 = tpu.matmul %83, %81, %cst_75 {dimension_numbers = #tpu.dot_dimension_numbers<[1], [1], [0], [0], [0, 0, 1, 0], [], []>} : vector<12x4xbf16>, vector<256x4xbf16>, vector<12x256xf32> -> vector<12x256xf32>
    %85 = arith.addf %76, %84 : vector<12x256xf32>
    %86 = vector.extract_strided_slice %85 {offsets = [0, 0], sizes = [4, 256], strides = [1, 1]} : vector<12x256xf32> to vector<4x256xf32>
    %87 = vector.extract_strided_slice %85 {offsets = [4, 0], sizes = [4, 256], strides = [1, 1]} : vector<12x256xf32> to vector<4x256xf32>
    %88 = vector.extract_strided_slice %85 {offsets = [8, 0], sizes = [4, 256], strides = [1, 1]} : vector<12x256xf32> to vector<4x256xf32>
    %89 = arith.negf %88 : vector<4x256xf32>
    %90 = math.exp %89 : vector<4x256xf32>
    %cst_76 = arith.constant 1.000000e+00 : f32
    %91 = vector.broadcast %cst_76 : f32 to vector<4x256xf32>
    %92 = arith.addf %91, %90 : vector<4x256xf32>
    %93 = arith.divf %91, %92 : vector<4x256xf32>
    %94 = arith.mulf %87, %93 : vector<4x256xf32>
    %95 = arith.addf %86, %94 : vector<4x256xf32>
    %c0_77 = arith.constant 0 : index
    %c0_78 = arith.constant 0 : index
    %c0_79 = arith.constant 0 : index
    %96 = vector.load %arg5[%c0_77, %c0_78, %c0_79] : memref<1x4x256xf32, #tpu.memory_space<vmem>>, vector<1x4x256xf32>
    %97 = vector.shape_cast %96 : vector<1x4x256xf32> to vector<4x256xf32>
    %98 = vector.shape_cast %95 : vector<4x256xf32> to vector<1x4x256xf32>
    tpu.vector_store %arg5[%c0_77, %c0_78, %c0_79], %98 {strides = array<i32>} : memref<1x4x256xf32, #tpu.memory_space<vmem>>, vector<1x4x256xf32>,
    return
  }
  func.func @transform_0(%arg0: i32, %arg1: i32) -> (i32, i32, i32, i32) {
    %c0_i32 = arith.constant 0 : i32
    %c0_i32_0 = arith.constant 0 : i32
    %c0_i32_1 = arith.constant 0 : i32
    %c0_i32_2 = arith.constant 0 : i32
    return %arg0, %c0_i32, %c0_i32_0, %c0_i32_1 : i32, i32, i32, i32
  }
  func.func @transform_1(%arg0: i32, %arg1: i32) -> (i32, i32, i32, i32) {
    %c0_i32 = arith.constant 0 : i32
    %c0_i32_0 = arith.constant 0 : i32
    %c0_i32_1 = arith.constant 0 : i32
    %c0_i32_2 = arith.constant 0 : i32
    %c0_i32_3 = arith.constant 0 : i32
    return %c0_i32, %c0_i32_0, %c0_i32_1, %c0_i32_2 : i32, i32, i32, i32
  }
  func.func @transform_2(%arg0: i32, %arg1: i32) -> (i32, i32) {
    %c0_i32 = arith.constant 0 : i32
    %c0_i32_0 = arith.constant 0 : i32
    %c0_i32_1 = arith.constant 0 : i32
    return %c0_i32, %c0_i32_0 : i32, i32
  }
  func.func @transform_3(%arg0: i32, %arg1: i32) -> (i32, i32, i32) {
    %c0_i32 = arith.constant 0 : i32
    %c0_i32_0 = arith.constant 0 : i32
    return %arg0, %c0_i32, %arg1 : i32, i32, i32
  }
}

</mosaic_0001>

<bundles_post_ra>
// kernel: gated_conv2d.1
= control target key start
LH: loop header
LB: loop body
LE: loop exit
PB: predicated region body
PF: predicated region fallthrough
CT: control target
= control target key end

     0   :  { %s4621_s12 = smov 0   ;;  %s4623_s13 = smov 0   ;;  %s6228_s0 = inlined_call_operand.vmem [shape: bf16[2,18,18,4], index: 0, kind: input, shape index: {}]   ;;  %s6229_s1 = inlined_call_operand.vmem [shape: bf16[3,3,12,4], index: 1, kind: input, shape index: {}]   ;;  %s6230_s2 = inlined_call_operand.vmem [shape: f32[12,1], index: 2, kind: input, shape index: {}]   ;;  %s6231_s3 = inlined_call_operand.vmem [shape: f32[2,4,256], index: 3, kind: output, shape index: {}]  }
   0x1   :  { %s4625_s14 = smov 0  }
   0x2 LB: > { %s25_s15 = sadd.s32 1, %s4594_s13  ;;  %p3755_p0 = scmp.ge.s32.totalorder %s4598_s14, 1  ;;  %s4598_s14 = sphi %s4625_s14, %s13_s14   ;;  %s4594_s13 = sphi %s4623_s13, %s6280_s13   ;;  %s4590_s12 = sphi %s4621_s12, %s6279_s12  }
   0x3   : > { %p27_p1 = scmp.ge.s32.totalorder %s25_s15, 2  ;;  %p151_p2 = scmp.lt.s32.totalorder %s4598_s14, 3 }
   0x5   : > { %s6282_s15 = smov (%p27_p1, %s25_s15), 0  ;;  %p152_p3 = pnand %p3755_p0, %p151_p2 }
   0x7   : > { %155 = sbr.rel (%p152_p3) target bundleno = 656 (0x290), region = 32 }
   0xe   : > { %p179_p4 = scmp.lt.s32.totalorder %s4590_s12, 1  ;;  %vm330_vm0 = vcmask 31744   ;;  %v4644_v0 = vld [vmem:[%s6229_s1] sm:$0x3f]   ;;  %vm477_vm1 = vsmask.f32 3328 }
   0xf   : > { %v4496_v1 = vld [vmem:[%s6229_s1 + $0x20] sm:$0x3f]   ;;  %4198 = vmatprep.mubr.msk.bf16.mxu1 %vm330_vm0, %v4644_v0  ;;  %vm478_vm2 = vsmask.f32 7440  ;;  %vm1082_vm4 = vcmask 1042432   ;;  %vm1083_vm5 = vcmask 1046532  }
  0x10   : > { %s6284_s12 = smov (!%p179_p4, %s4590_s12), 1  ;;  %4270 = vmatprep.mubr.msk.bf16.mxu0 %vm330_vm0, %v4496_v1  ;;  %vm4691_vm3 = vmor %vm477_vm1, %vm478_vm2  ;;  %v197_v33 = vld [vmem:[%s6230_s2 + $0x8] sm:$0xf] }
  0x11   : > { %s4452_s20 = smul.u32 216, %s6284_s12  ;;  %vm4884_vm6 = vmor %vm1082_vm4, %vm1083_vm5  ;;  %s4181_s21 = sshll.u32 %s6284_s12, 3 }
  0x12   : > { %s192_s24 = scalar_lea.vmem %s6231_s3, %s4181_s21 }
  0x13   : > { %s4656_s23 = scalar_lea.vmem %s6228_s0, %s4452_s20 }
  0x14   : > { %v4479_v2 = vld [vmem:[%s4656_s23 + $0x60] sm:$0xff]   ;;  %v4481_v4 = vld [vmem:[%s4656_s23 + $0x6c] sm:$0xff]   ;;  %v4669_v9 = vld [vmem:[%s4656_s23 + $0x74] sm:$0x1] }
  0x15   : > { %v4480_v3 = vld [vmem:[%s4656_s23] sm:$0xff]   ;;  %4380 = vmatprep.subr.msk.bf16.mxu1 %vm330_vm0, %v4479_v2  ;;  %v4482_v6 = vld [vmem:[%s4656_s23 + $0xc] sm:$0xff]   ;;  %v1833_v16 = vshll.u32 %v4669_v9, 16  ;;  %v4682_v22 = vld [vmem:[%s4656_s23 + $0x14] sm:$0x1]  ;;  %v2284_v25 = vrot.slane %v4669_v9, 5 }
  0x16   : > { %v335_v5 = vsel %vm330_vm0, %v4480_v3, 0  ;;  %v3909_v7 = vld [vmem:[%s4656_s23 + $0x6c] sm:$0xf]  ;;  %v4666_v8 = vld [vmem:[%s4656_s23 + $0x70] sm:$0xf]  ;;  %v338_v14 = vsel %vm330_vm0, %v4482_v6, 0 }
  0x17   : > { %4183 = vmatpush3.bf16.xpose.msra.mxu1 %v335_v5  ;;  %v1814_v10 = vshrl.u32 %v3909_v7, 16  ;;  %v1817_v11 = vshll.u32 %v3909_v7, 16  ;;  %v1823_v12 = vshll.u32 %v4666_v8, 16  ;;  %v3885_v13 = vld [vmem:[%s4656_s23 + $0xc] sm:$0xf]  ;;  %v1827_v15 = vshrl.u32 %v4666_v8, 16 }
  0x18   : > { %4381 = vmatprep.subr.msk.bf16.mxu1 %vm330_vm0, %v4481_v4  ;;  %v2281_v17 = vrot.slane %v4666_v8, 5  ;;  %v4679_v18 = vld [vmem:[%s4656_s23 + $0x10] sm:$0xf]  ;;  %v1622_v23 = vshrl.u32 %v3885_v13, 16  ;;  %v1625_v26 = vshll.u32 %v3885_v13, 16  ;;  %v1641_v31 = vshll.u32 %v4682_v22, 16 }
  0x19   : > { %v1816_v19 = vrot.slane %v1814_v10, 4  ;;  %v1819_v20 = vrot.slane %v1817_v11, 5  ;;  %v1825_v21 = vrot.slane %v1823_v12, 5  ;;  %v1829_v24 = vrot.slane %v1827_v15, 4  ;;  %v4483_v32 = vld [vmem:[%s4656_s23 + $0x78] sm:$0xff]   ;;  %v4485_v1 = vld [vmem:[%s4656_s23 + $0x84] sm:$0xff]  }
  0x1a   : > { %v1631_v27 = vshll.u32 %v4679_v18, 16  ;;  %v1624_v29 = vrot.slane %v1622_v23, 4  ;;  %v1635_v30 = vshrl.u32 %v4679_v18, 16  ;;  %v1835_v35 = vrot.slane %v1833_v16, 5  ;;  %v4484_v38 = vld [vmem:[%s4656_s23 + $0x18] sm:$0xff]   ;;  %v4486_v6 = vld [vmem:[%s4656_s23 + $0x24] sm:$0xff]  }
  0x1b   : > { %v1820_v28 = vor.u32 %v1819_v20, %v1816_v19  ;;  %v1830_v34 = vor.u32 %v1829_v24, %v1825_v21  ;;  %v1627_v36 = vrot.slane %v1625_v26, 5  ;;  %v1643_v41 = vrot.slane %v1641_v31, 5  ;;  %v3912_v46 = vld [vmem:[%s4656_s23 + $0x78] sm:$0xf]  ;;  %v4700_v47 = vld [vmem:[%s4656_s23 + $0x7c] sm:$0xf] }
  0x1c   : > { %v1633_v37 = vrot.slane %v1631_v27, 5  ;;  %v1637_v40 = vrot.slane %v1635_v30, 4  ;;  %v2228_v42 = vrot.slane %v4682_v22, 5  ;;  %v341_v45 = vsel %vm330_vm0, %v4484_v38, 0  ;;  %v4706_v50 = vld [vmem:[%s4656_s23 + $0x80] sm:$0x1] }
  0x1d   : > { %v1821_v39 = vrot.slane %v1820_v28, 4  ;;  %v1831_v43 = vrot.slane %v1830_v34, 4  ;;  %v1628_v44 = vor.u32 %v1627_v36, %v1624_v29  ;;  %v1838_v51 = vshrl.u32 %v3912_v46, 16  ;;  %v3888_v53 = vld [vmem:[%s4656_s23 + $0x18] sm:$0xf] }
  0x1e   : > { %v1638_v49 = vor.u32 %v1637_v40, %v1633_v37  ;;  %v1841_v52 = vshll.u32 %v3912_v46, 16  ;;  %v1847_v56 = vshll.u32 %v4700_v47, 16  ;;  %v1851_v57 = vshrl.u32 %v4700_v47, 16  ;;  %v4714_v58 = vld [vmem:[%s4656_s23 + $0x1c] sm:$0xf] }
  0x1f   : > { %4185 = vmatpush3.bf16.xpose.msra.mxu1 %v338_v14  ;;  %v1826_v48 = vsel %vm4691_vm3, %v1821_v39, %v1825_v21  ;;  %v1836_v54 = vsel %vm4691_vm3, %v1831_v43, %v1835_v35  ;;  %v1629_v55 = vrot.slane %v1628_v44, 4  ;;  %v1840_v61 = vrot.slane %v1838_v51, 4  ;;  %v4717_v63 = vld [vmem:[%s4656_s23 + $0x20] sm:$0x1]  ;;  %v3915_v24 = vld [vmem:[%s4656_s23 + $0x84] sm:$0xf] }
  0x20   : > { %4382 = vmatprep.subr.msk.bf16.mxu1 %vm330_vm0, %v4483_v32  ;;  %v3944_v59 = vcombine.low %v1826_v48, %v1836_v54  ;;  %v1639_v60 = vrot.slane %v1638_v49, 4  ;;  %v1843_v62 = vrot.slane %v1841_v52, 5  ;;  %v1849_v3 = vrot.slane %v1847_v56, 5  ;;  %v3916_v30 = vld [vmem:[%s4656_s23 + $0x88] sm:$0xf]  ;;  %v4487_v49 = vld [vmem:[%s4656_s23 + $0x90] sm:$0xff]  }
  0x21   : > { %v1634_v2 = vsel %vm4691_vm3, %v1629_v55, %v1633_v37  ;;  %v1853_v4 = vrot.slane %v1851_v57, 4  ;;  %v1857_v5 = vshll.u32 %v4706_v50, 16  ;;  %v1646_v11 = vshrl.u32 %v3888_v53, 16  ;;  %v3917_v36 = vld [vmem:[%s4656_s23 + $0x8c] sm:$0x1] }
  0x22   : > { %4412 = vmatprep.subr.msk.bf16.mxu0 %vm330_vm0, %v3944_v59  ;;  %v1644_v7 = vsel %vm4691_vm3, %v1639_v60, %v1643_v41  ;;  %v1844_v10 = vor.u32 %v1843_v62, %v1840_v61  ;;  %v1649_v12 = vshll.u32 %v3888_v53, 16  ;;  %v1655_v16 = vshll.u32 %v4714_v58, 16  ;;  %v3891_v37 = vld [vmem:[%s4656_s23 + $0x24] sm:$0xf]  ;;  %v3892_v43 = vld [vmem:[%s4656_s23 + $0x28] sm:$0xf] }
  0x23   : > { %v3936_v13 = vcombine.low %v1634_v2, %v1644_v7  ;;  %v1854_v14 = vor.u32 %v1853_v4, %v1849_v3  ;;  %v1859_v15 = vrot.slane %v1857_v5, 5  ;;  %v1648_v20 = vrot.slane %v1646_v11, 4  ;;  %v4488_v60 = vld [vmem:[%s4656_s23 + $0x30] sm:$0xff]   ;;  %v4748_v2 = vld [vmem:[%s4656_s23 + $0x2c] sm:$0x1] }
  0x24   : > { %v1845_v19 = vrot.slane %v1844_v10, 4  ;;  %v1651_v21 = vrot.slane %v1649_v12, 5  ;;  %v1659_v23 = vshrl.u32 %v4714_v58, 16  ;;  %v1657_v28 = vrot.slane %v1655_v16, 5 }
  0x25   : > { %v2065_v26 = vsel %vm330_vm0, %v3936_v13, 0  ;;  %v1855_v27 = vrot.slane %v1854_v14, 4  ;;  %v1665_v29 = vshll.u32 %v4717_v63, 16  ;;  %v344_v35 = vsel %vm330_vm0, %v4486_v6, 0  ;;  %v3918_v14 = vld [vmem:[%s4656_s23 + $0x90] sm:$0xf] }
  0x26   : > { %4255 = vmatpush3.bf16.xpose.msra.mxu0 %v2065_v26  ;;  %v1850_v31 = vsel %vm4691_vm3, %v1845_v19, %v1849_v3  ;;  %v1652_v32 = vor.u32 %v1651_v21, %v1648_v20  ;;  %v1661_v34 = vrot.slane %v1659_v23, 4  ;;  %v1862_v40 = vshrl.u32 %v3915_v24, 16  ;;  %v3920_v23 = vld [vmem:[%s4656_s23 + $0x98] sm:$0x1] }
  0x27   : > { %4187 = vmatpush3.bf16.xpose.msra.mxu1 %v341_v45  ;;  %v1860_v38 = vsel %vm4691_vm3, %v1855_v27, %v1859_v15  ;;  %v1667_v39 = vrot.slane %v1665_v29, 5  ;;  %v1865_v41 = vshll.u32 %v3915_v24, 16  ;;  %v1871_v48 = vshll.u32 %v3916_v30, 16  ;;  %v3919_v15 = vld [vmem:[%s4656_s23 + $0x94] sm:$0xf] }
  0x28   : > { %4383 = vmatprep.subr.msk.bf16.mxu1 %vm330_vm0, %v4485_v1  ;;  %v3945_v44 = vcombine.low %v1850_v31, %v1860_v38  ;;  %v1653_v45 = vrot.slane %v1652_v32, 4  ;;  %v1662_v46 = vor.u32 %v1661_v34, %v1657_v28  ;;  %v1864_v51 = vrot.slane %v1862_v40, 4  ;;  %v3894_v29 = vld [vmem:[%s4656_s23 + $0x30] sm:$0xf] }
  0x29   : > { %v1867_v52 = vrot.slane %v1865_v41, 5  ;;  %v1875_v53 = vshrl.u32 %v3916_v30, 16  ;;  %v1881_v54 = vshll.u32 %v3917_v36, 16  ;;  %v1873_v57 = vrot.slane %v1871_v48, 5 }
  0x2a   : > { %4413 = vmatprep.subr.msk.bf16.mxu0 %vm330_vm0, %v3945_v44  ;;  %v1658_v55 = vsel %vm4691_vm3, %v1653_v45, %v1657_v28  ;;  %v1663_v56 = vrot.slane %v1662_v46, 4  ;;  %v1670_v59 = vshrl.u32 %v3891_v37, 16  ;;  %v1673_v3 = vshll.u32 %v3891_v37, 16  ;;  %v4489_v45 = vld [vmem:[%s4656_s23 + $0x9c] sm:$0xff]  }
  0x2b   : > { %v1868_v61 = vor.u32 %v1867_v52, %v1864_v51  ;;  %v1877_v62 = vrot.slane %v1875_v53, 4  ;;  %v1883_v1 = vrot.slane %v1881_v54, 5  ;;  %v1679_v6 = vshll.u32 %v3892_v43, 16  ;;  %v3896_v54 = vld [vmem:[%s4656_s23 + $0x38] sm:$0x1] }
  0x2c   : > { %v1668_v4 = vsel %vm4691_vm3, %v1663_v56, %v1667_v39  ;;  %v1672_v5 = vrot.slane %v1670_v59, 4  ;;  %v1683_v7 = vshrl.u32 %v3892_v43, 16  ;;  %v1675_v13 = vrot.slane %v1673_v3, 5  ;;  %v3922_v3 = vld [vmem:[%s4656_s23 + $0xa0] sm:$0xf] }
  0x2d   : > { %v3937_v10 = vcombine.low %v1658_v55, %v1668_v4  ;;  %v1869_v11 = vrot.slane %v1868_v61, 4  ;;  %v1878_v12 = vor.u32 %v1877_v62, %v1873_v57  ;;  %v1681_v16 = vrot.slane %v1679_v6, 5 }
  0x2e   : > { %v1685_v19 = vrot.slane %v1683_v7, 4  ;;  %v1689_v20 = vshll.u32 %v4748_v2, 16  ;;  %v347_v21 = vsel %vm330_vm0, %v4488_v60, 0  ;;  %v1676_v28 = vor.u32 %v1675_v13, %v1672_v5 }
  0x2f   : > { %4189 = vmatpush3.bf16.xpose.msra.mxu1 %v344_v35  ;;  %v2068_v24 = vsel %vm330_vm0, %v3937_v10, 0  ;;  %v1874_v26 = vsel %vm4691_vm3, %v1869_v11, %v1873_v57  ;;  %v1879_v27 = vrot.slane %v1878_v12, 4  ;;  %v1886_v32 = vshrl.u32 %v3918_v14, 16  ;;  %v3895_v35 = vld [vmem:[%s4656_s23 + $0x34] sm:$0xf]  ;;  %v4490_v57 = vld [vmem:[%s4656_s23 + $0x3c] sm:$0xff]  }
  0x30   : > { %4384 = vmatprep.subr.msk.bf16.mxu1 %vm330_vm0, %v4487_v49  ;;  %4257 = vmatpush3.bf16.xpose.msra.mxu0 %v2068_v24  ;;  %v1686_v30 = vor.u32 %v1685_v19, %v1681_v16  ;;  %v1691_v31 = vrot.slane %v1689_v20, 5  ;;  %v1889_v34 = vshll.u32 %v3918_v14, 16  ;;  %v1677_v37 = vrot.slane %v1676_v28, 4  ;;  %v3923_v10 = vld [vmem:[%s4656_s23 + $0xa4] sm:$0x1] }
  0x31   : > { %v1884_v36 = vsel %vm4691_vm3, %v1879_v27, %v1883_v1  ;;  %v1895_v38 = vshll.u32 %v3919_v15, 16  ;;  %v1899_v39 = vshrl.u32 %v3919_v15, 16  ;;  %v1888_v43 = vrot.slane %v1886_v32, 4  ;;  %v3921_v1 = vld [vmem:[%s4656_s23 + $0x9c] sm:$0xf]  ;;  %v4491_v32 = vld [vmem:[%s4656_s23 + $0xa8] sm:$0xff]  }
  0x32   : > { %v3946_v40 = vcombine.low %v1874_v26, %v1884_v36  ;;  %v1687_v41 = vrot.slane %v1686_v30, 4  ;;  %v1891_v44 = vrot.slane %v1889_v34, 5  ;;  %v1682_v46 = vsel %vm4691_vm3, %v1677_v37, %v1681_v16  ;;  %v3897_v15 = vld [vmem:[%s4656_s23 + $0x3c] sm:$0xf] }
  0x33   : > { %v1897_v48 = vrot.slane %v1895_v38, 5  ;;  %v1901_v49 = vrot.slane %v1899_v39, 4  ;;  %v1905_v51 = vshll.u32 %v3920_v23, 16  ;;  %v1694_v55 = vshrl.u32 %v3894_v29, 16  ;;  %v3898_v38 = vld [vmem:[%s4656_s23 + $0x40] sm:$0xf] }
  0x34   : > { %4414 = vmatprep.subr.msk.bf16.mxu0 %vm330_vm0, %v3946_v40  ;;  %v1692_v52 = vsel %vm4691_vm3, %v1687_v41, %v1691_v31  ;;  %v1892_v53 = vor.u32 %v1891_v44, %v1888_v43  ;;  %v1697_v56 = vshll.u32 %v3894_v29, 16  ;;  %v1703_v62 = vshll.u32 %v3895_v35, 16  ;;  %v3899_v43 = vld [vmem:[%s4656_s23 + $0x44] sm:$0x1] }
  0x35   : > { %v3938_v59 = vcombine.low %v1682_v46, %v1692_v52  ;;  %v1902_v60 = vor.u32 %v1901_v49, %v1897_v48  ;;  %v1907_v61 = vrot.slane %v1905_v51, 5  ;;  %v1696_v5 = vrot.slane %v1694_v55, 4  ;;  %v3924_v52 = vld [vmem:[%s4656_s23 + $0xa8] sm:$0xf] }
  0x36   : > { %v1893_v4 = vrot.slane %v1892_v53, 4  ;;  %v1699_v6 = vrot.slane %v1697_v56, 5  ;;  %v1707_v7 = vshrl.u32 %v3895_v35, 16  ;;  %v1705_v13 = vrot.slane %v1703_v62, 5 }
  0x37   : > { %4191 = vmatpush3.bf16.xpose.msra.mxu1 %v347_v21  ;;  %v2071_v11 = vsel %vm330_vm0, %v3938_v59, 0  ;;  %v1903_v12 = vrot.slane %v1902_v60, 4  ;;  %v1713_v14 = vshll.u32 %v3896_v54, 16  ;;  %v350_v21 = vsel %vm330_vm0, %v4490_v57, 0  ;;  %v3925_v57 = vld [vmem:[%s4656_s23 + $0xac] sm:$0xf] }
  0x38   : > { %4385 = vmatprep.subr.msk.bf16.mxu1 %vm330_vm0, %v4489_v45  ;;  %4259 = vmatpush3.bf16.xpose.msra.mxu0 %v2071_v11  ;;  %v1898_v16 = vsel %vm4691_vm3, %v1893_v4, %v1897_v48  ;;  %v1700_v19 = vor.u32 %v1699_v6, %v1696_v5  ;;  %v1709_v20 = vrot.slane %v1707_v7, 4  ;;  %v1910_v26 = vshrl.u32 %v3921_v1, 16  ;;  %v4492_v45 = vld [vmem:[%s4656_s23 + $0x48] sm:$0xff]  }
  0x39   : > { %v1908_v23 = vsel %vm4691_vm3, %v1903_v12, %v1907_v61  ;;  %v1715_v24 = vrot.slane %v1713_v14, 5  ;;  %v1913_v27 = vshll.u32 %v3921_v1, 16  ;;  %v1919_v31 = vshll.u32 %v3922_v3, 16  ;;  %v3926_v14 = vld [vmem:[%s4656_s23 + $0xb0] sm:$0x1] }
  0x3a   : > { %v3947_v28 = vcombine.low %v1898_v16, %v1908_v23  ;;  %v1701_v29 = vrot.slane %v1700_v19, 4  ;;  %v1710_v30 = vor.u32 %v1709_v20, %v1705_v13  ;;  %v1912_v34 = vrot.slane %v1910_v26, 4  ;;  %v4493_v19 = vld [vmem:[%s4656_s23 + $0xb4] sm:$0xff]   ;;  %v3900_v26 = vld [vmem:[%s4656_s23 + $0x48] sm:$0xf] }
  0x3b   : > { %v1915_v35 = vrot.slane %v1913_v27, 5  ;;  %v1923_v36 = vshrl.u32 %v3922_v3, 16  ;;  %v1929_v37 = vshll.u32 %v3923_v10, 16  ;;  %v1921_v41 = vrot.slane %v1919_v31, 5  ;;  %v3901_v31 = vld [vmem:[%s4656_s23 + $0x4c] sm:$0xf] }
  0x3c   : > { %4415 = vmatprep.subr.msk.bf16.mxu0 %vm330_vm0, %v3947_v28  ;;  %v1706_v39 = vsel %vm4691_vm3, %v1701_v29, %v1705_v13  ;;  %v1711_v40 = vrot.slane %v1710_v30, 4  ;;  %v1718_v44 = vshrl.u32 %v3897_v15, 16  ;;  %v1721_v51 = vshll.u32 %v3897_v15, 16 }
  0x3d   : > { %v1916_v46 = vor.u32 %v1915_v35, %v1912_v34  ;;  %v1925_v48 = vrot.slane %v1923_v36, 4  ;;  %v1931_v49 = vrot.slane %v1929_v37, 5  ;;  %v1727_v55 = vshll.u32 %v3898_v38, 16 }
  0x3e   : > { %v1716_v53 = vsel %vm4691_vm3, %v1711_v40, %v1715_v24  ;;  %v1720_v54 = vrot.slane %v1718_v44, 4  ;;  %v1731_v56 = vshrl.u32 %v3898_v38, 16  ;;  %v1723_v62 = vrot.slane %v1721_v51, 5 }
  0x3f   : > { %4193 = vmatpush3.bf16.xpose.msra.mxu1 %v350_v21  ;;  %v3939_v59 = vcombine.low %v1706_v39, %v1716_v53  ;;  %v1917_v60 = vrot.slane %v1916_v46, 4  ;;  %v1926_v61 = vor.u32 %v1925_v48, %v1921_v41  ;;  %v1729_v1 = vrot.slane %v1727_v55, 5  ;;  %v3902_v39 = vld [vmem:[%s4656_s23 + $0x50] sm:$0x1] }
  0x40   : > { %4386 = vmatprep.subr.msk.bf16.mxu1 %vm330_vm0, %v4491_v32  ;;  %v1733_v3 = vrot.slane %v1731_v56, 4  ;;  %v1737_v4 = vshll.u32 %v3899_v43, 16  ;;  %v353_v5 = vsel %vm330_vm0, %v4492_v45, 0  ;;  %v1724_v11 = vor.u32 %v1723_v62, %v1720_v54  ;;  %v4494_v43 = vld [vmem:[%s4656_s23 + $0x54] sm:$0xff]  }
  0x41   : > { %v2074_v6 = vsel %vm330_vm0, %v3939_v59, 0  ;;  %v1922_v7 = vsel %vm4691_vm3, %v1917_v60, %v1921_v41  ;;  %v1927_v10 = vrot.slane %v1926_v61, 4  ;;  %v1934_v15 = vshrl.u32 %v3924_v52, 16  ;;  %v3927_v54 = vld [vmem:[%s4656_s23 + $0xb4] sm:$0xf] }
  0x42   : > { %4261 = vmatpush3.bf16.xpose.msra.mxu0 %v2074_v6  ;;  %v1734_v12 = vor.u32 %v1733_v3, %v1729_v1  ;;  %v1739_v13 = vrot.slane %v1737_v4, 5  ;;  %v1937_v16 = vshll.u32 %v3924_v52, 16  ;;  %v1725_v21 = vrot.slane %v1724_v11, 4  ;;  %v3928_v60 = vld [vmem:[%s4656_s23 + $0xb8] sm:$0xf] }
  0x43   : > { %v1932_v20 = vsel %vm4691_vm3, %v1927_v10, %v1931_v49  ;;  %v1943_v23 = vshll.u32 %v3925_v57, 16  ;;  %v1947_v24 = vshrl.u32 %v3925_v57, 16  ;;  %v1936_v29 = vrot.slane %v1934_v15, 4  ;;  %v3929_v4 = vld [vmem:[%s4656_s23 + $0xbc] sm:$0x1] }
  0x44   : > { %v3948_v27 = vcombine.low %v1922_v7, %v1932_v20  ;;  %v1735_v28 = vrot.slane %v1734_v12, 4  ;;  %v1939_v30 = vrot.slane %v1937_v16, 5  ;;  %v1730_v32 = vsel %vm4691_vm3, %v1725_v21, %v1729_v1  ;;  %v3903_v11 = vld [vmem:[%s4656_s23 + $0x54] sm:$0xf] }
  0x45   : > { %v1945_v34 = vrot.slane %v1943_v23, 5  ;;  %v1949_v35 = vrot.slane %v1947_v24, 4  ;;  %v1953_v36 = vshll.u32 %v3926_v14, 16  ;;  %v1742_v40 = vshrl.u32 %v3900_v26, 16  ;;  %v3904_v23 = vld [vmem:[%s4656_s23 + $0x58] sm:$0xf] }
  0x46   : > { %4416 = vmatprep.subr.msk.bf16.mxu0 %vm330_vm0, %v3948_v27  ;;  %v1740_v37 = vsel %vm4691_vm3, %v1735_v28, %v1739_v13  ;;  %v1940_v38 = vor.u32 %v1939_v30, %v1936_v29  ;;  %v1745_v41 = vshll.u32 %v3900_v26, 16  ;;  %v1751_v48 = vshll.u32 %v3901_v31, 16  ;;  %v3905_v28 = vld [vmem:[%s4656_s23 + $0x5c] sm:$0x1] }
  0x47   : > { %4195 = vmatpush3.bf16.xpose.msra.mxu1 %v353_v5  ;;  %v3940_v44 = vcombine.low %v1730_v32, %v1740_v37  ;;  %v1950_v45 = vor.u32 %v1949_v35, %v1945_v34  ;;  %v1955_v46 = vrot.slane %v1953_v36, 5  ;;  %v1744_v51 = vrot.slane %v1742_v40, 4  ;;  %v453_v35 = vld [vmem:[%s4656_s23 + $0x60] sm:$0xf] }
  0x48   : > { %4387 = vmatprep.subr.msk.bf16.mxu1 %vm330_vm0, %v4493_v19  ;;  %v1941_v49 = vrot.slane %v1940_v38, 4  ;;  %v1747_v52 = vrot.slane %v1745_v41, 5  ;;  %v1755_v53 = vshrl.u32 %v3901_v31, 16  ;;  %v1753_v57 = vrot.slane %v1751_v48, 5 }
  0x49   : > { %v2077_v55 = vsel %vm330_vm0, %v3940_v44, 0  ;;  %v1951_v56 = vrot.slane %v1950_v45, 4  ;;  %v1761_v59 = vshll.u32 %v3902_v39, 16  ;;  %v356_v3 = vsel %vm330_vm0, %v4494_v43, 0 }
  0x4a   : > { %4263 = vmatpush3.bf16.xpose.msra.mxu0 %v2077_v55  ;;  %v1946_v61 = vsel %vm4691_vm3, %v1941_v49, %v1945_v34  ;;  %v1748_v62 = vor.u32 %v1747_v52, %v1744_v51  ;;  %v1757_v1 = vrot.slane %v1755_v53, 4  ;;  %v1958_v7 = vshrl.u32 %v3927_v54, 16  ;;  %v454_v49 = vld [vmem:[%s4656_s23 + $0x64] sm:$0xf] }
  0x4b   : > { %v1956_v5 = vsel %vm4691_vm3, %v1951_v56, %v1955_v46  ;;  %v1763_v6 = vrot.slane %v1761_v59, 5  ;;  %v1961_v10 = vshll.u32 %v3927_v54, 16  ;;  %v1967_v15 = vshll.u32 %v3928_v60, 16  ;;  %v455_v56 = vld [vmem:[%s4656_s23 + $0x68] sm:$0x1] }
  0x4c   : > { %v3949_v12 = vcombine.low %v1946_v61, %v1956_v5  ;;  %v1749_v13 = vrot.slane %v1748_v62, 4  ;;  %v1758_v14 = vor.u32 %v1757_v1, %v1753_v57  ;;  %v1960_v16 = vrot.slane %v1958_v7, 4  ;;  %v429_v62 = vld [vmem:[%s4656_s23] sm:$0xf] }
  0x4d   : > { %v1963_v19 = vrot.slane %v1961_v10, 5  ;;  %v1971_v20 = vshrl.u32 %v3928_v60, 16  ;;  %v1977_v21 = vshll.u32 %v3929_v4, 16  ;;  %v1969_v27 = vrot.slane %v1967_v15, 5 }
  0x4e   : > { %4417 = vmatprep.subr.msk.bf16.mxu0 %vm330_vm0, %v3949_v12  ;;  %v1754_v24 = vsel %vm4691_vm3, %v1749_v13, %v1753_v57  ;;  %v1759_v26 = vrot.slane %v1758_v14, 4  ;;  %v1766_v29 = vshrl.u32 %v3903_v11, 16  ;;  %v1769_v34 = vshll.u32 %v3903_v11, 16  ;;  %v430_v12 = vld [vmem:[%s4656_s23 + $0x4] sm:$0xf] }
  0x4f   : > { %4197 = vmatpush3.bf16.xpose.msra.mxu1 %v356_v3  ;;  %v1964_v30 = vor.u32 %v1963_v19, %v1960_v16  ;;  %v1973_v31 = vrot.slane %v1971_v20, 4  ;;  %v1979_v32 = vrot.slane %v1977_v21, 5  ;;  %v1775_v38 = vshll.u32 %v3904_v23, 16  ;;  %v431_v16 = vld [vmem:[%s4656_s23 + $0x8] sm:$0x1] }
  0x50   : > { %v1764_v36 = vsel %vm4691_vm3, %v1759_v26, %v1763_v6  ;;  %v1768_v37 = vrot.slane %v1766_v29, 4  ;;  %v1779_v39 = vshrl.u32 %v3904_v23, 16  ;;  %v1771_v44 = vrot.slane %v1769_v34, 5 }
  0x51   : > { %v3941_v40 = vcombine.low %v1754_v24, %v1764_v36  ;;  %v1965_v41 = vrot.slane %v1964_v30, 4  ;;  %v1974_v43 = vor.u32 %v1973_v31, %v1969_v27  ;;  %v1777_v45 = vrot.slane %v1775_v38, 5  ;;  %v3930_v24 = vld [vmem:[%s4656_s23 + $0xc0] sm:$0xf] }
  0x52   : > { %v1781_v46 = vrot.slane %v1779_v39, 4  ;;  %v1785_v48 = vshll.u32 %v3905_v28, 16  ;;  %v673_v51 = vshrl.u32 %v453_v35, 16  ;;  %v1772_v55 = vor.u32 %v1771_v44, %v1768_v37 }
  0x53   : > { %v2080_v52 = vsel %vm330_vm0, %v3941_v40, 0  ;;  %v1970_v53 = vsel %vm4691_vm3, %v1965_v41, %v1969_v27  ;;  %v1975_v54 = vrot.slane %v1974_v43, 4  ;;  %v676_v61 = vshll.u32 %v453_v35, 16  ;;  %v3931_v35 = vld [vmem:[%s4656_s23 + $0xc4] sm:$0xf] }
  0x54   : > { %4265 = vmatpush3.bf16.xpose.msra.mxu0 %v2080_v52  ;;  %v1782_v57 = vor.u32 %v1781_v46, %v1777_v45  ;;  %v1787_v59 = vrot.slane %v1785_v48, 5  ;;  %v675_v60 = vrot.slane %v673_v51, 4  ;;  %v1773_v3 = vrot.slane %v1772_v55, 4  ;;  %v3906_v46 = vld [vmem:[%s4656_s23 + $0x60] sm:$0xf] }
  0x55   : > { %v1980_v1 = vsel %vm4691_vm3, %v1975_v54, %v1979_v32  ;;  %v682_v4 = vshll.u32 %v454_v49, 16  ;;  %v686_v5 = vshrl.u32 %v454_v49, 16  ;;  %v678_v10 = vrot.slane %v676_v61, 5 }
  0x56   : > { %4199 = vmatmul.mubr.msk.bf16.vlgmr.msra.gmra.mrb[0].mxu1 %vm330_vm0, %v4644_v0  ;;  %v3950_v6 = vcombine.low %v1970_v53, %v1980_v1  ;;  %v1783_v7 = vrot.slane %v1782_v57, 4  ;;  %v692_v11 = vshll.u32 %v455_v56, 16  ;;  %v1778_v13 = vsel %vm4691_vm3, %v1773_v3, %v1777_v45  ;;  %v3932_v45 = vld [vmem:[%s4656_s23 + $0xc8] sm:$0x1]  ;;  %v3907_v57 = vld [vmem:[%s4656_s23 + $0x64] sm:$0xf] }
  0x57   : > { %v684_v14 = vrot.slane %v682_v4, 5  ;;  %v688_v15 = vrot.slane %v686_v5, 4  ;;  %v481_v0 = vshrl.u32 %v429_v62, 16  ;;  %v679_v20 = vor.u32 %v678_v10, %v675_v60  ;;  %v3908_v5 = vld [vmem:[%s4656_s23 + $0x68] sm:$0x1] }
  0x58   : > { %4418 = vmatprep.subr.msk.bf16.mxu0 %vm330_vm0, %v3950_v6  ;;  %v1788_v19 = vsel %vm4691_vm3, %v1783_v7, %v1787_v59  ;;  %v694_v21 = vrot.slane %v692_v11, 5  ;;  %v484_v23 = vshll.u32 %v429_v62, 16  ;;  %v490_v29 = vshll.u32 %v430_v12, 16 }
  0x59   : > { %v3942_v26 = vcombine.low %v1778_v13, %v1788_v19  ;;  %v689_v27 = vor.u32 %v688_v15, %v684_v14  ;;  %v483_v28 = vrot.slane %v481_v0, 4  ;;  %v680_v30 = vrot.slane %v679_v20, 4  ;;  %v456_v13 = vld [vmem:[%s4656_s23 + $0x6c] sm:$0xf] }
  0x5a   : > { %v486_v31 = vrot.slane %v484_v23, 5  ;;  %v494_v32 = vshrl.u32 %v430_v12, 16  ;;  %v500_v34 = vshll.u32 %v431_v16, 16  ;;  %v492_v38 = vrot.slane %v490_v29, 5  ;;  %v458_v29 = vld [vmem:[%s4656_s23 + $0x74] sm:$0x1] }
  0x5b   : > { %v2083_v36 = vsel %vm330_vm0, %v3942_v26, 0  ;;  %v690_v37 = vrot.slane %v689_v27, 4  ;;  %v1982_v39 = vshrl.u32 %v3930_v24, 16  ;;  %v685_v40 = vsel %vm4691_vm3, %v680_v30, %v684_v14 }
  0x5c   : > { %4267 = vmatpush3.bf16.xpose.msra.mxu0 %v2083_v36  ;;  %v487_v41 = vor.u32 %v486_v31, %v483_v28  ;;  %v496_v43 = vrot.slane %v494_v32, 4  ;;  %v502_v44 = vrot.slane %v500_v34, 5  ;;  %v1985_v51 = vshll.u32 %v3930_v24, 16  ;;  %v457_v24 = vld [vmem:[%s4656_s23 + $0x70] sm:$0xf] }
  0x5d   : > { %v695_v48 = vsel %vm4691_vm3, %v690_v37, %v694_v21  ;;  %v1984_v49 = vrot.slane %v1982_v39, 4  ;;  %v1991_v52 = vshll.u32 %v3931_v35, 16  ;;  %v1995_v56 = vshrl.u32 %v3931_v35, 16  ;;  %v432_v36 = vld [vmem:[%s4656_s23 + $0xc] sm:$0xf] }
  0x5e   : > { %v3788_v53 = vcombine.low %v685_v40, %v695_v48  ;;  %v488_v54 = vrot.slane %v487_v41, 4  ;;  %v497_v55 = vor.u32 %v496_v43, %v492_v38  ;;  %v1987_v59 = vrot.slane %v1985_v51, 5 }
  0x5f   : > { %v1993_v60 = vrot.slane %v1991_v52, 5  ;;  %v2001_v61 = vshll.u32 %v3932_v45, 16  ;;  %v1790_v62 = vshrl.u32 %v3906_v46, 16  ;;  %v1997_v4 = vrot.slane %v1995_v56, 4  ;;  %v434_v52 = vld [vmem:[%s4656_s23 + $0x14] sm:$0x1] }
  0x60   : > { %4388 = vmatprep.subr.msk.bf16.mxu1 %vm330_vm0, %v3788_v53  ;;  %v493_v1 = vsel %vm4691_vm3, %v488_v54, %v492_v38  ;;  %v498_v3 = vrot.slane %v497_v55, 4  ;;  %v1793_v6 = vshll.u32 %v3906_v46, 16  ;;  %v1988_v7 = vor.u32 %v1987_v59, %v1984_v49  ;;  %v433_v46 = vld [vmem:[%s4656_s23 + $0x10] sm:$0xf]  ;;  %v3961_v59 = vld [vmem:[%s4656_s23 + $0x6c] sm:$0xe] }
  0x61   : > { %v2003_v10 = vrot.slane %v2001_v61, 5  ;;  %v1792_v11 = vrot.slane %v1790_v62, 4  ;;  %v1799_v12 = vshll.u32 %v3907_v57, 16  ;;  %v1998_v15 = vor.u32 %v1997_v4, %v1993_v60 }
  0x62   : > { %v503_v14 = vsel %vm4691_vm3, %v498_v3, %v502_v44  ;;  %v1795_v16 = vrot.slane %v1793_v6, 5  ;;  %v1803_v0 = vshrl.u32 %v3907_v57, 16  ;;  %v1989_v20 = vrot.slane %v1988_v7, 4 }
  0x63   : > { %v3780_v19 = vcombine.low %v493_v1, %v503_v14  ;;  %v1801_v21 = vrot.slane %v1799_v12, 5  ;;  %v1809_v23 = vshll.u32 %v3908_v5, 16  ;;  %v1999_v26 = vrot.slane %v1998_v15, 4  ;;  %v3953_v14 = vld [vmem:[%s4656_s23 + $0xc] sm:$0xe] }
  0x64   : > { %v1796_v27 = vor.u32 %v1795_v16, %v1792_v11  ;;  %v1805_v28 = vrot.slane %v1803_v0, 4  ;;  %v697_v30 = vshrl.u32 %v456_v13, 16  ;;  %v1994_v32 = vsel %vm4691_vm3, %v1989_v20, %v1993_v60  ;;  %v459_v20 = vld [vmem:[%s4656_s23 + $0x78] sm:$0xf] }
  0x65   : > { %v924_v31 = vsel %vm330_vm0, %v3780_v19, 0  ;;  %v1811_v34 = vrot.slane %v1809_v23, 5  ;;  %v700_v35 = vshll.u32 %v456_v13, 16  ;;  %v2004_v37 = vsel %vm4691_vm3, %v1999_v26, %v2003_v10 }
  0x66   : > { %4201 = vmatpush3.bf16.xpose.msra.mxu1 %v924_v31  ;;  %v1797_v38 = vrot.slane %v1796_v27, 4  ;;  %v1806_v39 = vor.u32 %v1805_v28, %v1801_v21  ;;  %v699_v40 = vrot.slane %v697_v30, 4  ;;  %v3951_v41 = vcombine.low %v1994_v32, %v2004_v37  ;;  %v4903_v31 = vld [vmem:[%s4656_s23 + $0x7c] sm:$0xf] }
  0x67   : > { %v702_v43 = vrot.slane %v700_v35, 5  ;;  %v706_v44 = vshll.u32 %v457_v24, 16  ;;  %v710_v45 = vshrl.u32 %v457_v24, 16  ;;  %v716_v51 = vshll.u32 %v458_v29, 16 }
  0x68   : > { %v1802_v48 = vsel %vm4691_vm3, %v1797_v38, %v1801_v21  ;;  %v1807_v49 = vrot.slane %v1806_v39, 4  ;;  %v505_v53 = vshrl.u32 %v432_v36, 16  ;;  %4419 = vmatprep.subr.msk.bf16.mxu0 %vm330_vm0, %v3951_v41  ;;  %v508_v57 = vshll.u32 %v432_v36, 16  ;;  %v4910_v36 = vld [vmem:[%s4656_s23 + $0x80] sm:$0x1] }
  0x69   : > { %v703_v54 = vor.u32 %v702_v43, %v699_v40  ;;  %v708_v55 = vrot.slane %v706_v44, 5  ;;  %v712_v56 = vrot.slane %v710_v45, 4  ;;  %v718_v61 = vrot.slane %v716_v51, 5 }
  0x6a   : > { %v1812_v60 = vsel %vm4691_vm3, %v1807_v49, %v1811_v34  ;;  %v507_v62 = vrot.slane %v505_v53, 4  ;;  %v514_v1 = vshll.u32 %v433_v46, 16  ;;  %v510_v6 = vrot.slane %v508_v57, 5 }
  0x6b   : > { %v3943_v3 = vcombine.low %v1802_v48, %v1812_v60  ;;  %v704_v4 = vrot.slane %v703_v54, 4  ;;  %v713_v5 = vor.u32 %v712_v56, %v708_v55  ;;  %v518_v11 = vshrl.u32 %v433_v46, 16  ;;  %v4927_v46 = vld [vmem:[%s4656_s23 + $0x1c] sm:$0xf]  ;;  %v4932_v54 = vld [vmem:[%s4656_s23 + $0x20] sm:$0x1] }
  0x6c   : > { %v516_v10 = vrot.slane %v514_v1, 5  ;;  %v524_v12 = vshll.u32 %v434_v52, 16  ;;  %v3977_v13 = vrot.slane %v3961_v59, 9  ;;  %v511_v19 = vor.u32 %v510_v6, %v507_v62  ;;  %v3962_v59 = vld [vmem:[%s4656_s23 + $0x78] sm:$0xe] }
  0x6d   : > { %v2086_v15 = vsel %vm330_vm0, %v3943_v3, 0  ;;  %v709_v16 = vsel %vm4691_vm3, %v704_v4, %v708_v55  ;;  %v714_v0 = vrot.slane %v713_v5, 4  ;;  %v520_v21 = vrot.slane %v518_v11, 4 }
  0x6e   : > { %4269 = vmatpush3.bf16.xpose.msra.mxu0 %v2086_v15  ;;  %v526_v23 = vrot.slane %v524_v12, 5  ;;  %v2282_v24 = vsel %vm4884_vm6, %v3977_v13, %v2281_v17  ;;  %v2283_v26 = vrot.slane %v2281_v17, 4  ;;  %v512_v28 = vrot.slane %v511_v19, 4  ;;  %v435_v17 = vld [vmem:[%s4656_s23 + $0x18] sm:$0xf] }
  0x6f   : > { %v719_v27 = vsel %vm4691_vm3, %v714_v0, %v718_v61  ;;  %v3969_v29 = vrot.slane %v3953_v14, 9  ;;  %v2225_v30 = vrot.slane %v4679_v18, 5  ;;  %v521_v34 = vor.u32 %v520_v21, %v516_v10 }
  0x70   : > { %v3789_v32 = vcombine.low %v709_v16, %v719_v27  ;;  %v2285_v35 = vsel %vm4884_vm6, %v2283_v26, %v2284_v25  ;;  %v721_v8 = vshrl.u32 %v459_v20, 16  ;;  %v517_v37 = vsel %vm4691_vm3, %v512_v28, %v516_v10  ;;  %v3954_v10 = vld [vmem:[%s4656_s23 + $0x18] sm:$0xe]  ;;  %v462_v26 = vld [vmem:[%s4656_s23 + $0x84] sm:$0xf] }
  0x71   : > { %v3996_v38 = vcombine.low %v2282_v24, %v2285_v35  ;;  %v2226_v18 = vsel %vm4884_vm6, %v3969_v29, %v2225_v30  ;;  %v2227_v39 = vrot.slane %v2225_v30, 4  ;;  %v522_v9 = vrot.slane %v521_v34, 4  ;;  %v4953_v27 = vld [vmem:[%s6229_s1 + $0x8] sm:$0x3f]  }
  0x72   : > { %4389 = vmatprep.subr.msk.bf16.mxu1 %vm330_vm0, %v3789_v32  ;;  %v723_v40 = vrot.slane %v721_v8, 4  ;;  %v724_v41 = vshll.u32 %v459_v20, 16  ;;  %v730_v25 = vshll.u32 %v4903_v31, 16  ;;  %v734_v44 = vshrl.u32 %v4903_v31, 16  ;;  %v4960_v32 = vld [vmem:[%s4656_s23 + $0x88] sm:$0xf]  ;;  %4216 = vmatprep.mubr.msk.bf16.mxu1 %vm330_vm0, %v4953_v27 }
  0x73   : > { %4420 = vmatprep.subr.msk.bf16.mxu0 %vm330_vm0, %v3996_v38  ;;  %v2229_v43 = vsel %vm4884_vm6, %v2227_v39, %v2228_v42  ;;  %v740_v45 = vshll.u32 %v4910_v36, 16  ;;  %v529_v48 = vshrl.u32 %v435_v17, 16  ;;  %v527_v49 = vsel %vm4691_vm3, %v522_v9, %v526_v23  ;;  %v4544_v42 = vld [vmem:[%s6229_s1 + $0x20] sm:$0x3f]  }
  0x74   : > { %v3988_v51 = vcombine.low %v2226_v18, %v2229_v43  ;;  %v726_v52 = vrot.slane %v724_v41, 5  ;;  %v732_v53 = vrot.slane %v730_v25, 5  ;;  %v3781_v22 = vcombine.low %v517_v37, %v527_v49  ;;  %v438_v9 = vld [vmem:[%s4656_s23 + $0x24] sm:$0xf]  ;;  %v4978_v25 = vld [vmem:[%s4656_s23 + $0x28] sm:$0xf] }
  0x75   : > { %4271 = vmatmul.mubr.msk.bf16.vlgmr.msra.gmra.mrb[0].mxu0 %vm330_vm0, %v4544_v42  ;;  %v736_v55 = vrot.slane %v734_v44, 4  ;;  %v742_v56 = vrot.slane %v740_v45, 5  ;;  %v531_v57 = vrot.slane %v529_v48, 4  ;;  %v532_v62 = vshll.u32 %v435_v17, 16  ;;  %v4965_v17 = vld [vmem:[%s4656_s23 + $0x8c] sm:$0x1] }
  0x76   : > { %v2395_v60 = vsel %vm330_vm0, %v3988_v51, 0  ;;  %v727_v61 = vor.u32 %v726_v52, %v723_v40  ;;  %v538_v1 = vshll.u32 %v4927_v46, 16  ;;  %v927_v3 = vsel %vm330_vm0, %v3781_v22, 0  ;;  %v4983_v43 = vld [vmem:[%s6229_s1 + $0x28] sm:$0x3f]  }
  0x77   : > { %4273 = vmatpush3.bf16.xpose.msra.mxu0 %v2395_v60  ;;  %v737_v4 = vor.u32 %v736_v55, %v732_v53  ;;  %v542_v5 = vshrl.u32 %v4927_v46, 16  ;;  %v548_v6 = vshll.u32 %v4932_v54, 16  ;;  %4203 = vmatpush3.bf16.xpose.msra.mxu1 %v927_v3  ;;  %v534_v12 = vrot.slane %v532_v62, 5  ;;  %v4989_v51 = vld [vmem:[%s4656_s23 + $0x2c] sm:$0x1] }
  0x78   : > { %v728_v11 = vrot.slane %v727_v61, 4  ;;  %v540_v13 = vrot.slane %v538_v1, 5  ;;  %v3978_v14 = vrot.slane %v3962_v59, 9  ;;  %v2288_v19 = vrot.slane %v4700_v47, 5  ;;  %4288 = vmatprep.mubr.msk.bf16.mxu0 %vm330_vm0, %v4983_v43  ;;  %v3963_v60 = vld [vmem:[%s4656_s23 + $0x84] sm:$0xe] }
  0x79   : > { %v738_v15 = vrot.slane %v737_v4, 4  ;;  %v544_v16 = vrot.slane %v542_v5, 4  ;;  %v550_v0 = vrot.slane %v548_v6, 5  ;;  %v535_v21 = vor.u32 %v534_v12, %v531_v57  ;;  %v3955_v4 = vld [vmem:[%s4656_s23 + $0x24] sm:$0xe] }
  0x7a   : > { %v733_v20 = vsel %vm4691_vm3, %v728_v11, %v732_v53  ;;  %v2291_v23 = vrot.slane %v4706_v50, 5  ;;  %v3970_v24 = vrot.slane %v3954_v10, 9  ;;  %v2289_v47 = vsel %vm4884_vm6, %v3978_v14, %v2288_v19 }
  0x7b   : > { %v743_v28 = vsel %vm4691_vm3, %v738_v15, %v742_v56  ;;  %v545_v29 = vor.u32 %v544_v16, %v540_v13  ;;  %v2290_v30 = vrot.slane %v2288_v19, 4  ;;  %v536_v50 = vrot.slane %v535_v21, 4  ;;  %v465_v16 = vld [vmem:[%s4656_s23 + $0x90] sm:$0xf]  ;;  %v4545_v21 = vld [vmem:[%s4656_s23 + $0x88] sm:$0xf] }
  0x7c   : > { %v3790_v34 = vcombine.low %v733_v20, %v743_v28  ;;  %v2232_v35 = vrot.slane %v4714_v58, 5  ;;  %v2235_v8 = vrot.slane %v4717_v63, 5  ;;  %v745_v18 = vshrl.u32 %v462_v26, 16 }
  0x7d   : > { %v546_v37 = vrot.slane %v545_v29, 4  ;;  %v2292_v38 = vsel %vm4884_vm6, %v2290_v30, %v2291_v23  ;;  %v748_v39 = vshll.u32 %v462_v26, 16  ;;  %v541_v58 = vsel %vm4691_vm3, %v536_v50, %v540_v13  ;;  %v4546_v50 = vld [vmem:[%s4656_s23 + $0x8c] sm:$0x1] }
  0x7e   : > { %4390 = vmatprep.subr.msk.bf16.mxu1 %vm330_vm0, %v3790_v34  ;;  %v3997_v40 = vcombine.low %v2289_v47, %v2292_v38  ;;  %v2233_v63 = vsel %vm4884_vm6, %v3970_v24, %v2232_v35  ;;  %v2234_v41 = vrot.slane %v2232_v35, 4  ;;  %v747_v45 = vrot.slane %v745_v18, 4  ;;  %v5010_v47 = vld [vmem:[%s4656_s23 + $0x94] sm:$0xf] }
  0x7f   : > { %v551_v44 = vsel %vm4691_vm3, %v546_v37, %v550_v0  ;;  %v750_v48 = vrot.slane %v748_v39, 5  ;;  %v754_v49 = vshll.u32 %v4960_v32, 16  ;;  %v758_v22 = vshrl.u32 %v4960_v32, 16  ;;  %v5016_v37 = vld [vmem:[%s4656_s23 + $0x98] sm:$0x1] }
  0x80   : > { %v3782_v52 = vcombine.low %v541_v58, %v551_v44  ;;  %4421 = vmatprep.subr.msk.bf16.mxu0 %vm330_vm0, %v3997_v40  ;;  %v2236_v53 = vsel %vm4884_vm6, %v2234_v41, %v2235_v8  ;;  %v764_v42 = vshll.u32 %v4965_v17, 16  ;;  %v553_v59 = vshrl.u32 %v438_v9, 16  ;;  %v441_v40 = vld [vmem:[%s4656_s23 + $0x30] sm:$0xf] }
  0x81   : > { %v3989_v55 = vcombine.low %v2233_v63, %v2236_v53  ;;  %v751_v56 = vor.u32 %v750_v48, %v747_v45  ;;  %v756_v57 = vrot.slane %v754_v49, 5  ;;  %v760_v62 = vrot.slane %v758_v22, 4  ;;  %v5030_v22 = vld [vmem:[%s4656_s23 + $0x34] sm:$0xf] }
  0x82   : > { %v930_v61 = vsel %vm330_vm0, %v3782_v52, 0  ;;  %v766_v1 = vrot.slane %v764_v42, 5  ;;  %v556_v3 = vshll.u32 %v438_v9, 16  ;;  %v555_v10 = vrot.slane %v553_v59, 4  ;;  %v4547_v9 = vld [vmem:[%s4656_s23 + $0x28] sm:$0xf] }
  0x83   : > { %4205 = vmatpush3.bf16.xpose.msra.mxu1 %v930_v61  ;;  %v2398_v5 = vsel %vm330_vm0, %v3989_v55, 0  ;;  %v752_v6 = vrot.slane %v751_v56, 4  ;;  %v562_v11 = vshll.u32 %v4978_v25, 16  ;;  %v761_v12 = vor.u32 %v760_v62, %v756_v57 }
  0x84   : > { %4275 = vmatpush3.bf16.xpose.msra.mxu0 %v2398_v5  ;;  %v558_v13 = vrot.slane %v556_v3, 5  ;;  %v566_v14 = vshrl.u32 %v4978_v25, 16  ;;  %v572_v15 = vshll.u32 %v4989_v51, 16  ;;  %v3979_v20 = vrot.slane %v3963_v60, 9 }
  0x85   : > { %v757_v0 = vsel %vm4691_vm3, %v752_v6, %v756_v57  ;;  %v564_v19 = vrot.slane %v562_v11, 5  ;;  %v2295_v23 = vrot.slane %v4545_v21, 5  ;;  %v762_v24 = vrot.slane %v761_v12, 4 }
  0x86   : > { %v559_v26 = vor.u32 %v558_v13, %v555_v10  ;;  %v568_v28 = vrot.slane %v566_v14, 4  ;;  %v574_v29 = vrot.slane %v572_v15, 5  ;;  %v2298_v35 = vrot.slane %v4546_v50, 5 }
  0x87   : > { %v2296_v30 = vsel %vm4884_vm6, %v3979_v20, %v2295_v23  ;;  %v2297_v34 = vrot.slane %v2295_v23, 4  ;;  %v3971_v8 = vrot.slane %v3955_v4, 9  ;;  %v767_v38 = vsel %vm4691_vm3, %v762_v24, %v766_v1  ;;  %v3964_v1 = vld [vmem:[%s4656_s23 + $0x90] sm:$0xe] }
  0x88   : > { %v560_v18 = vrot.slane %v559_v26, 4  ;;  %v569_v39 = vor.u32 %v568_v28, %v564_v19  ;;  %v2239_v58 = vrot.slane %v4547_v9, 5  ;;  %v3791_v63 = vcombine.low %v757_v0, %v767_v38  ;;  %v3956_v24 = vld [vmem:[%s4656_s23 + $0x30] sm:$0xe]  ;;  %v4548_v38 = vld [vmem:[%s4656_s23 + $0x94] sm:$0xf] }
  0x89   : > { %v2299_v41 = vsel %vm4884_vm6, %v2297_v34, %v2298_v35  ;;  %v2242_v44 = vrot.slane %v4748_v2, 5  ;;  %v769_v45 = vshrl.u32 %v465_v16, 16  ;;  %v772_v56 = vshll.u32 %v465_v16, 16  ;;  %v5035_v2 = vld [vmem:[%s4656_s23 + $0x38] sm:$0x1] }
  0x8a   : > { %v565_v48 = vsel %vm4691_vm3, %v560_v18, %v564_v19  ;;  %v570_v49 = vrot.slane %v569_v39, 4  ;;  %v3998_v52 = vcombine.low %v2296_v30, %v2299_v41  ;;  %v2240_v53 = vsel %vm4884_vm6, %v3971_v8, %v2239_v58  ;;  %4391 = vmatprep.subr.msk.bf16.mxu1 %vm330_vm0, %v3791_v63  ;;  %v468_v34 = vld [vmem:[%s4656_s23 + $0x9c] sm:$0xf] }
  0x8b   : > { %v2241_v42 = vrot.slane %v2239_v58, 4  ;;  %v771_v55 = vrot.slane %v769_v45, 4  ;;  %v778_v57 = vshll.u32 %v5010_v47, 16  ;;  %v782_v60 = vshrl.u32 %v5010_v47, 16  ;;  %v4549_v58 = vld [vmem:[%s4656_s23 + $0x98] sm:$0x1] }
  0x8c   : > { %v575_v59 = vsel %vm4691_vm3, %v570_v49, %v574_v29  ;;  %4422 = vmatprep.subr.msk.bf16.mxu0 %vm330_vm0, %v3998_v52  ;;  %v788_v61 = vshll.u32 %v5016_v37, 16  ;;  %v577_v62 = vshrl.u32 %v441_v40, 16  ;;  %v774_v5 = vrot.slane %v772_v56, 5  ;;  %v5061_v49 = vld [vmem:[%s4656_s23 + $0xa0] sm:$0xf] }
  0x8d   : > { %v3783_v3 = vcombine.low %v565_v48, %v575_v59  ;;  %v2243_v4 = vsel %vm4884_vm6, %v2241_v42, %v2242_v44  ;;  %v780_v6 = vrot.slane %v778_v57, 5  ;;  %v784_v11 = vrot.slane %v782_v60, 4  ;;  %v5064_v52 = vld [vmem:[%s4656_s23 + $0xa4] sm:$0x1]  ;;  %v4551_v57 = vld [vmem:[%s4656_s23 + $0x38] sm:$0x1] }
  0x8e   : > { %v3990_v10 = vcombine.low %v2240_v53, %v2243_v4  ;;  %v790_v12 = vrot.slane %v788_v61, 5  ;;  %v579_v13 = vrot.slane %v577_v62, 4  ;;  %v775_v15 = vor.u32 %v774_v5, %v771_v55  ;;  %v4550_v55 = vld [vmem:[%s4656_s23 + $0x34] sm:$0xf]  ;;  %v444_v60 = vld [vmem:[%s4656_s23 + $0x3c] sm:$0xf] }
  0x8f   : > { %v933_v14 = vsel %vm330_vm0, %v3783_v3, 0  ;;  %v580_v16 = vshll.u32 %v441_v40, 16  ;;  %v586_v0 = vshll.u32 %v5030_v22, 16  ;;  %v785_v20 = vor.u32 %v784_v11, %v780_v6  ;;  %v5077_v11 = vld [vmem:[%s4656_s23 + $0x40] sm:$0xf] }
  0x90   : > { %4207 = vmatpush3.bf16.xpose.msra.mxu1 %v933_v14  ;;  %v2401_v19 = vsel %vm330_vm0, %v3990_v10, 0  ;;  %v590_v21 = vshrl.u32 %v5030_v22, 16  ;;  %v596_v23 = vshll.u32 %v5035_v2, 16  ;;  %v776_v26 = vrot.slane %v775_v15, 4 }
  0x91   : > { %4277 = vmatpush3.bf16.xpose.msra.mxu0 %v2401_v19  ;;  %v582_v28 = vrot.slane %v580_v16, 5  ;;  %v588_v29 = vrot.slane %v586_v0, 5  ;;  %v3980_v30 = vrot.slane %v3964_v1, 9  ;;  %v786_v50 = vrot.slane %v785_v20, 4  ;;  %v5083_v16 = vld [vmem:[%s4656_s23 + $0x44] sm:$0x1] }
  0x92   : > { %v592_v35 = vrot.slane %v590_v21, 4  ;;  %v598_v8 = vrot.slane %v596_v23, 5  ;;  %v2302_v18 = vrot.slane %v4548_v38, 5  ;;  %v781_v39 = vsel %vm4691_vm3, %v776_v26, %v780_v6  ;;  %v3965_v23 = vld [vmem:[%s4656_s23 + $0x9c] sm:$0xe] }
  0x93   : > { %v583_v9 = vor.u32 %v582_v28, %v579_v13  ;;  %v2305_v40 = vrot.slane %v4549_v58, 5  ;;  %v3972_v63 = vrot.slane %v3956_v24, 9  ;;  %v791_v41 = vsel %vm4691_vm3, %v786_v50, %v790_v12 }
  0x94   : > { %v593_v44 = vor.u32 %v592_v35, %v588_v29  ;;  %v2303_v45 = vsel %vm4884_vm6, %v3980_v30, %v2302_v18  ;;  %v2304_v48 = vrot.slane %v2302_v18, 4  ;;  %v3792_v53 = vcombine.low %v781_v39, %v791_v41 }
  0x95   : > { %v584_v42 = vrot.slane %v583_v9, 4  ;;  %v2246_v56 = vrot.slane %v4550_v55, 5  ;;  %v2249_v59 = vrot.slane %v4551_v57, 5  ;;  %v793_v1 = vshrl.u32 %v468_v34, 16  ;;  %v3957_v9 = vld [vmem:[%s4656_s23 + $0x3c] sm:$0xe] }
  0x96   : > { %v594_v61 = vrot.slane %v593_v44, 4  ;;  %v2306_v62 = vsel %vm4884_vm6, %v2304_v48, %v2305_v40  ;;  %v796_v3 = vshll.u32 %v468_v34, 16  ;;  %4392 = vmatprep.subr.msk.bf16.mxu1 %vm330_vm0, %v3792_v53  ;;  %v802_v15 = vshll.u32 %v5061_v49, 16  ;;  %v471_v44 = vld [vmem:[%s4656_s23 + $0xa8] sm:$0xf] }
  0x97   : > { %v589_v4 = vsel %vm4691_vm3, %v584_v42, %v588_v29  ;;  %v3999_v5 = vcombine.low %v2303_v45, %v2306_v62  ;;  %v2247_v6 = vsel %vm4884_vm6, %v3972_v63, %v2246_v56  ;;  %v2248_v10 = vrot.slane %v2246_v56, 4  ;;  %v4552_v42 = vld [vmem:[%s4656_s23 + $0xa0] sm:$0xf] }
  0x98   : > { %v599_v12 = vsel %vm4691_vm3, %v594_v61, %v598_v8  ;;  %v795_v13 = vrot.slane %v793_v1, 4  ;;  %v798_v14 = vrot.slane %v796_v3, 5  ;;  %v806_v20 = vshrl.u32 %v5061_v49, 16  ;;  %v5102_v61 = vld [vmem:[%s4656_s23 + $0xac] sm:$0xf] }
  0x99   : > { %v3784_v0 = vcombine.low %v589_v4, %v599_v12  ;;  %4423 = vmatprep.subr.msk.bf16.mxu0 %vm330_vm0, %v3999_v5  ;;  %v2250_v19 = vsel %vm4884_vm6, %v2248_v10, %v2249_v59  ;;  %v812_v21 = vshll.u32 %v5064_v52, 16  ;;  %v804_v28 = vrot.slane %v802_v15, 5  ;;  %v4553_v3 = vld [vmem:[%s4656_s23 + $0xa4] sm:$0x1]  ;;  %v447_v10 = vld [vmem:[%s4656_s23 + $0x48] sm:$0xf] }
  0x9a   : > { %v3991_v24 = vcombine.low %v2247_v6, %v2250_v19  ;;  %v799_v26 = vor.u32 %v798_v14, %v795_v13  ;;  %v601_v29 = vshrl.u32 %v444_v60, 16  ;;  %v808_v34 = vrot.slane %v806_v20, 4  ;;  %v5108_v6 = vld [vmem:[%s4656_s23 + $0xb0] sm:$0x1]  ;;  %v4554_v15 = vld [vmem:[%s4656_s23 + $0x40] sm:$0xf] }
  0x9b   : > { %v936_v30 = vsel %vm330_vm0, %v3784_v0, 0  ;;  %v814_v50 = vrot.slane %v812_v21, 5  ;;  %v604_v35 = vshll.u32 %v444_v60, 16  ;;  %v610_v39 = vshll.u32 %v5077_v11, 16  ;;  %v4555_v21 = vld [vmem:[%s4656_s23 + $0x44] sm:$0x1] }
  0x9c   : > { %4209 = vmatpush3.bf16.xpose.msra.mxu1 %v936_v30  ;;  %v2404_v8 = vsel %vm330_vm0, %v3991_v24, 0  ;;  %v800_v38 = vrot.slane %v799_v26, 4  ;;  %v603_v18 = vrot.slane %v601_v29, 4  ;;  %v809_v58 = vor.u32 %v808_v34, %v804_v28  ;;  %v5122_v34 = vld [vmem:[%s4656_s23 + $0x4c] sm:$0xf] }
  0x9d   : > { %4279 = vmatpush3.bf16.xpose.msra.mxu0 %v2404_v8  ;;  %v606_v40 = vrot.slane %v604_v35, 5  ;;  %v614_v63 = vshrl.u32 %v5077_v11, 16  ;;  %v620_v41 = vshll.u32 %v5083_v16, 16  ;;  %v612_v48 = vrot.slane %v610_v39, 5 }
  0x9e   : > { %v805_v45 = vsel %vm4691_vm3, %v800_v38, %v804_v28  ;;  %v3981_v53 = vrot.slane %v3965_v23, 9  ;;  %v2309_v55 = vrot.slane %v4552_v42, 5  ;;  %v810_v56 = vrot.slane %v809_v58, 4 }
  0x9f   : > { %v607_v57 = vor.u32 %v606_v40, %v603_v18  ;;  %v616_v59 = vrot.slane %v614_v63, 4  ;;  %v622_v60 = vrot.slane %v620_v41, 5  ;;  %v2312_v4 = vrot.slane %v4553_v3, 5 }
  0xa0   : > { %v2310_v62 = vsel %vm4884_vm6, %v3981_v53, %v2309_v55  ;;  %v2311_v1 = vrot.slane %v2309_v55, 4  ;;  %v3973_v5 = vrot.slane %v3957_v9, 9  ;;  %v815_v12 = vsel %vm4691_vm3, %v810_v56, %v814_v50  ;;  %v3966_v56 = vld [vmem:[%s4656_s23 + $0xa8] sm:$0xe] }
  0xa1   : > { %v608_v13 = vrot.slane %v607_v57, 4  ;;  %v617_v14 = vor.u32 %v616_v59, %v612_v48  ;;  %v2253_v0 = vrot.slane %v4554_v15, 5  ;;  %v3793_v19 = vcombine.low %v805_v45, %v815_v12  ;;  %v3958_v12 = vld [vmem:[%s4656_s23 + $0x48] sm:$0xe] }
  0xa2   : > { %v2313_v20 = vsel %vm4884_vm6, %v2311_v1, %v2312_v4  ;;  %v2256_v23 = vrot.slane %v4555_v21, 5  ;;  %v817_v24 = vshrl.u32 %v471_v44, 16  ;;  %v820_v8 = vshll.u32 %v471_v44, 16  ;;  %v5134_v44 = vld [vmem:[%s4656_s23 + $0x50] sm:$0x1] }
  0xa3   : > { %v613_v26 = vsel %vm4691_vm3, %v608_v13, %v612_v48  ;;  %v618_v28 = vrot.slane %v617_v14, 4  ;;  %v4000_v29 = vcombine.low %v2310_v62, %v2313_v20  ;;  %v2254_v30 = vsel %vm4884_vm6, %v3973_v5, %v2253_v0  ;;  %4393 = vmatprep.subr.msk.bf16.mxu1 %vm330_vm0, %v3793_v19  ;;  %v4556_v21 = vld [vmem:[%s4656_s23 + $0xac] sm:$0xf] }
  0xa4   : > { %v2255_v50 = vrot.slane %v2253_v0, 4  ;;  %v819_v35 = vrot.slane %v817_v24, 4  ;;  %v826_v38 = vshll.u32 %v5102_v61, 16  ;;  %v830_v39 = vshrl.u32 %v5102_v61, 16  ;;  %v474_v24 = vld [vmem:[%s4656_s23 + $0xb4] sm:$0xf] }
  0xa5   : > { %v623_v18 = vsel %vm4691_vm3, %v618_v28, %v622_v60  ;;  %4424 = vmatprep.subr.msk.bf16.mxu0 %vm330_vm0, %v4000_v29  ;;  %v836_v9 = vshll.u32 %v5108_v6, 16  ;;  %v625_v58 = vshrl.u32 %v447_v10, 16  ;;  %v822_v41 = vrot.slane %v820_v8, 5  ;;  %v4557_v29 = vld [vmem:[%s4656_s23 + $0xb0] sm:$0x1] }
  0xa6   : > { %v3785_v40 = vcombine.low %v613_v26, %v623_v18  ;;  %v2257_v63 = vsel %vm4884_vm6, %v2255_v50, %v2256_v23  ;;  %v828_v45 = vrot.slane %v826_v38, 5  ;;  %v832_v53 = vrot.slane %v830_v39, 4 }
  0xa7   : > { %v3992_v48 = vcombine.low %v2254_v30, %v2257_v63  ;;  %v838_v42 = vrot.slane %v836_v9, 5  ;;  %v627_v55 = vrot.slane %v625_v58, 4  ;;  %v823_v59 = vor.u32 %v822_v41, %v819_v35  ;;  %v4558_v58 = vld [vmem:[%s4656_s23 + $0x4c] sm:$0xf]  ;;  %v4559_v63 = vld [vmem:[%s4656_s23 + $0x50] sm:$0x1] }
  0xa8   : > { %v939_v57 = vsel %vm330_vm0, %v3785_v40, 0  ;;  %v628_v60 = vshll.u32 %v447_v10, 16  ;;  %v634_v62 = vshll.u32 %v5122_v34, 16  ;;  %v833_v3 = vor.u32 %v832_v53, %v828_v45 }
  0xa9   : > { %4211 = vmatpush3.bf16.xpose.msra.mxu1 %v939_v57  ;;  %v2407_v1 = vsel %vm330_vm0, %v3992_v48, 0  ;;  %v638_v4 = vshrl.u32 %v5122_v34, 16  ;;  %v644_v5 = vshll.u32 %v5134_v44, 16  ;;  %v824_v13 = vrot.slane %v823_v59, 4 }
  0xaa   : > { %4281 = vmatpush3.bf16.xpose.msra.mxu0 %v2407_v1  ;;  %v630_v14 = vrot.slane %v628_v60, 5  ;;  %v636_v15 = vrot.slane %v634_v62, 5  ;;  %v3982_v0 = vrot.slane %v3966_v56, 9  ;;  %v834_v10 = vrot.slane %v833_v3, 4  ;;  %v450_v1 = vld [vmem:[%s4656_s23 + $0x54] sm:$0xf] }
  0xab   : > { %v640_v19 = vrot.slane %v638_v4, 4  ;;  %v646_v20 = vrot.slane %v644_v5, 5  ;;  %v2316_v23 = vrot.slane %v4556_v21, 5  ;;  %v829_v26 = vsel %vm4691_vm3, %v824_v13, %v828_v45  ;;  %v5155_v45 = vld [vmem:[%s4656_s23 + $0xb8] sm:$0xf] }
  0xac   : > { %v631_v28 = vor.u32 %v630_v14, %v627_v55  ;;  %v2319_v30 = vrot.slane %v4557_v29, 5  ;;  %v3974_v50 = vrot.slane %v3958_v12, 9  ;;  %v839_v35 = vsel %vm4691_vm3, %v834_v10, %v838_v42  ;;  %v5160_v42 = vld [vmem:[%s4656_s23 + $0xbc] sm:$0x1]  ;;  %v5169_v3 = vld [vmem:[%s4656_s23 + $0x58] sm:$0xf] }
  0xad   : > { %v641_v8 = vor.u32 %v640_v19, %v636_v15  ;;  %v2317_v38 = vsel %vm4884_vm6, %v3982_v0, %v2316_v23  ;;  %v2318_v18 = vrot.slane %v2316_v23, 4  ;;  %v3794_v39 = vcombine.low %v829_v26, %v839_v35  ;;  %v5175_v14 = vld [vmem:[%s4656_s23 + $0x5c] sm:$0x1]  ;;  %v3967_v21 = vld [vmem:[%s4656_s23 + $0xb4] sm:$0xe] }
  0xae   : > { %v632_v9 = vrot.slane %v631_v28, 4  ;;  %v2260_v40 = vrot.slane %v4558_v58, 5  ;;  %v2263_v41 = vrot.slane %v4559_v63, 5  ;;  %v841_v55 = vshrl.u32 %v474_v24, 16  ;;  %v3959_v63 = vld [vmem:[%s4656_s23 + $0x54] sm:$0xe] }
  0xaf   : > { %v642_v48 = vrot.slane %v641_v8, 4  ;;  %v2320_v53 = vsel %vm4884_vm6, %v2318_v18, %v2319_v30  ;;  %v844_v56 = vshll.u32 %v474_v24, 16  ;;  %4394 = vmatprep.subr.msk.bf16.mxu1 %vm330_vm0, %v3794_v39  ;;  %v850_v13 = vshll.u32 %v5155_v45, 16 }
  0xb0   : > { %v637_v57 = vsel %vm4691_vm3, %v632_v9, %v636_v15  ;;  %v4001_v59 = vcombine.low %v2317_v38, %v2320_v53  ;;  %v2261_v60 = vsel %vm4884_vm6, %v3974_v50, %v2260_v40  ;;  %v2262_v62 = vrot.slane %v2260_v40, 4 }
  0xb1   : > { %v647_v4 = vsel %vm4691_vm3, %v642_v48, %v646_v20  ;;  %v843_v5 = vrot.slane %v841_v55, 4  ;;  %v846_v12 = vrot.slane %v844_v56, 5  ;;  %v854_v10 = vshrl.u32 %v5155_v45, 16  ;;  %v4560_v55 = vld [vmem:[%s4656_s23 + $0xb8] sm:$0xf] }
  0xb2   : > { %v3786_v0 = vcombine.low %v637_v57, %v647_v4  ;;  %4425 = vmatprep.subr.msk.bf16.mxu0 %vm330_vm0, %v4001_v59  ;;  %v2264_v15 = vsel %vm4884_vm6, %v2262_v62, %v2263_v41  ;;  %v860_v19 = vshll.u32 %v5160_v42, 16  ;;  %v852_v20 = vrot.slane %v850_v13, 5 }
  0xb3   : > { %v3993_v23 = vcombine.low %v2261_v60, %v2264_v15  ;;  %v847_v24 = vor.u32 %v846_v12, %v843_v5  ;;  %v649_v26 = vshrl.u32 %v450_v1, 16  ;;  %v856_v29 = vrot.slane %v854_v10, 4  ;;  %v4561_v12 = vld [vmem:[%s4656_s23 + $0xbc] sm:$0x1]  ;;  %v1018_v15 = vld [vmem:[%s4656_s23] sm:$0xe] }
  0xb4   : > { %v942_v28 = vsel %vm330_vm0, %v3786_v0, 0  ;;  %v862_v30 = vrot.slane %v860_v19, 5  ;;  %v652_v50 = vshll.u32 %v450_v1, 16  ;;  %v658_v18 = vshll.u32 %v5169_v3, 16  ;;  %v1026_v1 = vld [vmem:[%s4656_s23 + $0x60] sm:$0xe] }
  0xb5   : > { %4213 = vmatpush3.bf16.xpose.msra.mxu1 %v942_v28  ;;  %v2410_v35 = vsel %vm330_vm0, %v3993_v23, 0  ;;  %v848_v8 = vrot.slane %v847_v24, 4  ;;  %v651_v38 = vrot.slane %v649_v26, 4  ;;  %v857_v39 = vor.u32 %v856_v29, %v852_v20  ;;  %v4562_v23 = vld [vmem:[%s4656_s23 + $0x58] sm:$0xf] }
  0xb6   : > { %4283 = vmatpush3.bf16.xpose.msra.mxu0 %v2410_v35  ;;  %v654_v9 = vrot.slane %v652_v50, 5  ;;  %v662_v58 = vshrl.u32 %v5169_v3, 16  ;;  %v668_v40 = vshll.u32 %v5175_v14, 16  ;;  %v660_v48 = vrot.slane %v658_v18, 5  ;;  %v4563_v29 = vld [vmem:[%s4656_s23 + $0x5c] sm:$0x1] }
  0xb7   : > { %v853_v41 = vsel %vm4691_vm3, %v848_v8, %v852_v20  ;;  %v3983_v53 = vrot.slane %v3967_v21, 9  ;;  %v2323_v56 = vrot.slane %v4560_v55, 5  ;;  %v858_v57 = vrot.slane %v857_v39, 4  ;;  %v3968_v20 = vld [vmem:[%s4656_s23 + $0xc0] sm:$0xe] }
  0xb8   : > { %v655_v59 = vor.u32 %v654_v9, %v651_v38  ;;  %v664_v60 = vrot.slane %v662_v58, 4  ;;  %v670_v62 = vrot.slane %v668_v40, 5  ;;  %v2326_v13 = vrot.slane %v4561_v12, 5  ;;  %v4564_v9 = vld [vmem:[%s4656_s23 + $0x64] sm:$0xf] }
  0xb9   : > { %v2324_v4 = vsel %vm4884_vm6, %v3983_v53, %v2323_v56  ;;  %v2325_v5 = vrot.slane %v2323_v56, 4  ;;  %v3975_v0 = vrot.slane %v3959_v63, 9  ;;  %v863_v10 = vsel %vm4691_vm3, %v858_v57, %v862_v30  ;;  %v4565_v40 = vld [vmem:[%s4656_s23 + $0x68] sm:$0x1] }
  0xba   : > { %v656_v19 = vrot.slane %v655_v59, 4  ;;  %v665_v21 = vor.u32 %v664_v60, %v660_v48  ;;  %v2267_v24 = vrot.slane %v4562_v23, 5  ;;  %v3795_v26 = vcombine.low %v853_v41, %v863_v10  ;;  %v4567_v56 = vld [vmem:[%s4656_s23 + $0x8] sm:$0x1]  ;;  %v3960_v60 = vld [vmem:[%s4656_s23 + $0x60] sm:$0xe] }
  0xbb   : > { %v2327_v28 = vsel %vm4884_vm6, %v2325_v5, %v2326_v13  ;;  %v2270_v50 = vrot.slane %v4563_v29, 5  ;;  %v3805_v35 = vrot.slane %v1026_v1, 9  ;;  %v1143_v58 = vrot.slane %v4564_v9, 5  ;;  %v4568_v10 = vld [vmem:[%s4656_s23 + $0xc4] sm:$0xf] }
  0xbc   : > { %v661_v8 = vsel %vm4691_vm3, %v656_v19, %v660_v48  ;;  %v666_v30 = vrot.slane %v665_v21, 4  ;;  %v4002_v38 = vcombine.low %v2324_v4, %v2327_v28  ;;  %v2268_v18 = vsel %vm4884_vm6, %v3975_v0, %v2267_v24  ;;  %4395 = vmatprep.subr.msk.bf16.mxu1 %vm330_vm0, %v3795_v26  ;;  %v4566_v48 = vld [vmem:[%s4656_s23 + $0x4] sm:$0xf]  ;;  %v1019_v21 = vld [vmem:[%s4656_s23 + $0xc] sm:$0xe] }
  0xbd   : > { %v2269_v39 = vrot.slane %v2267_v24, 4  ;;  %v1146_v63 = vrot.slane %v4565_v40, 5  ;;  %v3797_v41 = vrot.slane %v1018_v15, 9  ;;  %v1087_v55 = vrot.slane %v4566_v48, 5  ;;  %v4571_v9 = vld [vmem:[%s4656_s23 + $0x68] sm:$0x1] }
  0xbe   : > { %v671_v53 = vsel %vm4691_vm3, %v666_v30, %v670_v62  ;;  %4426 = vmatprep.subr.msk.bf16.mxu0 %vm330_vm0, %v4002_v38  ;;  %v1090_v57 = vrot.slane %v4567_v56, 5  ;;  %v3984_v59 = vrot.slane %v3968_v20, 9  ;;  %v1144_v5 = vsel %vm4884_vm6, %v3805_v35, %v1143_v58  ;;  %v1027_v62 = vld [vmem:[%s4656_s23 + $0x6c] sm:$0xe]  ;;  %v4569_v20 = vld [vmem:[%s4656_s23 + $0xc8] sm:$0x1] }
  0xbf   : > { %v3787_v1 = vcombine.low %v661_v8, %v671_v53  ;;  %v2271_v4 = vsel %vm4884_vm6, %v2269_v39, %v2270_v50  ;;  %v1145_v12 = vrot.slane %v1143_v58, 4  ;;  %v1088_v0 = vsel %vm4884_vm6, %v3797_v41, %v1087_v55  ;;  %v4573_v53 = vld [vmem:[%s4656_s23 + $0x74] sm:$0x1]  ;;  %v1028_v56 = vld [vmem:[%s4656_s23 + $0x78] sm:$0xe] }
  0xc0   : > { %v3994_v13 = vcombine.low %v2268_v18, %v2271_v4  ;;  %v1089_v15 = vrot.slane %v1087_v55, 4  ;;  %v2330_v19 = vrot.slane %v4568_v10, 5  ;;  %v2333_v26 = vrot.slane %v4569_v20, 5  ;;  %v4570_v18 = vld [vmem:[%s4656_s23 + $0x64] sm:$0xf] }
  0xc1   : > { %v945_v23 = vsel %vm330_vm0, %v3787_v1, 0  ;;  %v1147_v24 = vsel %vm4884_vm6, %v1145_v12, %v1146_v63  ;;  %v3976_v28 = vrot.slane %v3960_v60, 9  ;;  %v2274_v39 = vrot.slane %v4570_v18, 5  ;;  %v4572_v63 = vld [vmem:[%s4656_s23 + $0x70] sm:$0xf] }
  0xc2   : > { %4215 = vmatpush3.bf16.xpose.msra.mxu1 %v945_v23  ;;  %v2413_v29 = vsel %vm330_vm0, %v3994_v13, 0  ;;  %v3824_v50 = vcombine.low %v1144_v5, %v1147_v24  ;;  %v1091_v35 = vsel %vm4884_vm6, %v1089_v15, %v1090_v57  ;;  %v2331_v8 = vsel %vm4884_vm6, %v3984_v59, %v2330_v19  ;;  %v4574_v12 = vld [vmem:[%s4656_s23 + $0x10] sm:$0xf]  ;;  %v1020_v13 = vld [vmem:[%s4656_s23 + $0x18] sm:$0xe] }
  0xc3   : > { %4285 = vmatpush3.bf16.xpose.msra.mxu0 %v2413_v29  ;;  %v3816_v30 = vcombine.low %v1088_v0, %v1091_v35  ;;  %v2332_v38 = vrot.slane %v2330_v19, 4  ;;  %v2277_v58 = vrot.slane %v4571_v9, 5  ;;  %v3806_v40 = vrot.slane %v1027_v62, 9  ;;  %v5252_v0 = vld [vmem:[%s6229_s1 + $0x10] sm:$0x3f]  }
  0xc4   : > { %4396 = vmatprep.subr.msk.bf16.mxu1 %vm330_vm0, %v3824_v50  ;;  %v1150_v41 = vrot.slane %v4572_v63, 5  ;;  %v1153_v48 = vrot.slane %v4573_v53, 5  ;;  %v3798_v55 = vrot.slane %v1019_v21, 9  ;;  %v2275_v59 = vsel %vm4884_vm6, %v3976_v28, %v2274_v39  ;;  %v4575_v19 = vld [vmem:[%s4656_s23 + $0x14] sm:$0x1]  ;;  %v4499_v50 = vld [vmem:[%s4656_s23 + $0x78] sm:$0xff]  }
  0xc5   : > { %v2334_v57 = vsel %vm4884_vm6, %v2332_v38, %v2333_v26  ;;  %v2276_v60 = vrot.slane %v2274_v39, 4  ;;  %v1094_v62 = vrot.slane %v4574_v12, 5  ;;  %v1257_v15 = vsel %vm330_vm0, %v3816_v30, 0  ;;  %v1029_v24 = vld [vmem:[%s4656_s23 + $0x84] sm:$0xe]  ;;  %v4504_v12 = vld [vmem:[%s4656_s23 + $0x30] sm:$0xff]  }
  0xc6   : > { %v4003_v1 = vcombine.low %v2331_v8, %v2334_v57  ;;  %v1151_v4 = vsel %vm4884_vm6, %v3806_v40, %v1150_v41  ;;  %v1152_v5 = vrot.slane %v1150_v41, 4  ;;  %v1097_v21 = vrot.slane %v4575_v19, 5  ;;  %v4500_v8 = vld [vmem:[%s4656_s23 + $0x18] sm:$0xff]   ;;  %v1021_v63 = vld [vmem:[%s4656_s23 + $0x24] sm:$0xe] }
  0xc7   : > { %v2278_v10 = vsel %vm4884_vm6, %v2276_v60, %v2277_v58  ;;  %v3807_v23 = vrot.slane %v1028_v56, 9  ;;  %v1095_v28 = vsel %vm4884_vm6, %v3798_v55, %v1094_v62  ;;  %v1096_v29 = vrot.slane %v1094_v62, 4  ;;  %v4502_v56 = vld [vmem:[%s4656_s23 + $0x24] sm:$0xff]   ;;  %v1031_v62 = vld [vmem:[%s4656_s23 + $0x9c] sm:$0xe] }
  0xc8   : > { %4427 = vmatprep.subr.msk.bf16.mxu0 %vm330_vm0, %v4003_v1  ;;  %v3995_v20 = vcombine.low %v2275_v59, %v2278_v10  ;;  %v1154_v26 = vsel %vm4884_vm6, %v1152_v5, %v1153_v48  ;;  %v1157_v30 = vrot.slane %v4903_v31, 5  ;;  %v1160_v38 = vrot.slane %v4910_v36, 5  ;;  %v1030_v59 = vld [vmem:[%s4656_s23 + $0x90] sm:$0xe]  ;;  %v4501_v19 = vld [vmem:[%s4656_s23 + $0x84] sm:$0xff]  }
  0xc9   : > { %4217 = vmatmul.mubr.msk.bf16.vlgmr.msra.gmra.mrb[0].mxu1 %vm330_vm0, %v4953_v27  ;;  %v3825_v35 = vcombine.low %v1151_v4, %v1154_v26  ;;  %v3799_v18 = vrot.slane %v1020_v13, 9  ;;  %v1098_v9 = vsel %vm4884_vm6, %v1096_v29, %v1097_v21  ;;  %v1101_v58 = vrot.slane %v4927_v46, 5  ;;  %v1022_v29 = vld [vmem:[%s4656_s23 + $0x30] sm:$0xe] }
  0xca   : > { %4219 = vmatpush3.bf16.xpose.msra.mxu1 %v1257_v15  ;;  %v2416_v39 = vsel %vm330_vm0, %v3995_v20, 0  ;;  %v1104_v40 = vrot.slane %v4932_v54, 5  ;;  %4234 = vmatprep.mubr.msk.bf16.mxu1 %vm330_vm0, %v5252_v0  ;;  %v3817_v31 = vcombine.low %v1095_v28, %v1098_v9  ;;  %v1158_v36 = vsel %vm4884_vm6, %v3807_v23, %v1157_v30 }
  0xcb   : > { %4287 = vmatpush3.bf16.xpose.msra.mxu0 %v2416_v39  ;;  %4397 = vmatprep.subr.msk.bf16.mxu1 %vm330_vm0, %v3825_v35  ;;  %v1159_v27 = vrot.slane %v1157_v30, 4  ;;  %v1102_v46 = vsel %vm4884_vm6, %v3799_v18, %v1101_v58  ;;  %v1103_v54 = vrot.slane %v1101_v58, 4  ;;  %v3808_v41 = vrot.slane %v1029_v24, 9  ;;  %v1032_v39 = vld [vmem:[%s4656_s23 + $0xa8] sm:$0xe] }
  0xcc   : > { %4428 = vmatprep.subr.msk.bf16.mxu0 %vm330_vm0, %v4499_v50  ;;  %v1164_v53 = vrot.slane %v4960_v32, 5  ;;  %v2617_v48 = vsel %vm330_vm0, %v4500_v8, 0  ;;  %v1167_v57 = vrot.slane %v4965_v17, 5  ;;  %v1260_v60 = vsel %vm330_vm0, %v3817_v31, 0  ;;  %v5302_v17 = vld [vmem:[%s6229_s1 + $0x30] sm:$0x3f]  }
  0xcd   : > { %v1161_v55 = vsel %vm4884_vm6, %v1159_v27, %v1160_v38  ;;  %v1105_v1 = vsel %vm4884_vm6, %v1103_v54, %v1104_v40  ;;  %v3800_v5 = vrot.slane %v1021_v63, 9  ;;  %v1108_v10 = vrot.slane %v4978_v25, 5  ;;  %v1023_v50 = vld [vmem:[%s4656_s23 + $0x3c] sm:$0xe]  ;;  %v1024_v31 = vld [vmem:[%s4656_s23 + $0x48] sm:$0xe] }
  0xce   : > { %v1166_v4 = vrot.slane %v1164_v53, 4  ;;  %v3826_v32 = vcombine.low %v1158_v36, %v1161_v55  ;;  %v3818_v13 = vcombine.low %v1102_v46, %v1105_v1  ;;  %v1165_v15 = vsel %vm4884_vm6, %v3808_v41, %v1164_v53  ;;  %v4503_v53 = vld [vmem:[%s4656_s23 + $0x90] sm:$0xff]  }
  0xcf   : > { %v1111_v23 = vrot.slane %v4989_v51, 5  ;;  %v3809_v24 = vrot.slane %v1030_v59, 9  ;;  %v1171_v20 = vrot.slane %v5010_v47, 5  ;;  %v1110_v26 = vrot.slane %v1108_v10, 4  ;;  %v1033_v59 = vld [vmem:[%s4656_s23 + $0xb4] sm:$0xe] }
  0xd0   : > { %v1168_v21 = vsel %vm4884_vm6, %v1166_v4, %v1167_v57  ;;  %v2620_v25 = vsel %vm330_vm0, %v4502_v56, 0  ;;  %v5313_v28 = vsel %vm330_vm0, %v4504_v12, 0  ;;  %v1174_v47 = vrot.slane %v5016_v37, 5 }
  0xd1   : > { %v3827_v51 = vcombine.low %v1165_v15, %v1168_v21  ;;  %v1173_v35 = vrot.slane %v1171_v20, 4  ;;  %v3810_v8 = vrot.slane %v1031_v62, 9  ;;  %v1263_v30 = vsel %vm330_vm0, %v3818_v13, 0 }
  0xd2   : > { %4221 = vmatpush3.bf16.xpose.msra.mxu1 %v1260_v60  ;;  %4289 = vmatmul.mubr.msk.bf16.vlgmr.msra.gmra.mrb[0].mxu0 %vm330_vm0, %v4983_v43  ;;  %v1109_v43 = vsel %vm4884_vm6, %v3800_v5, %v1108_v10  ;;  %v1112_v38 = vsel %vm4884_vm6, %v1110_v26, %v1111_v23  ;;  %v5327_v18 = vsel %vm4884_vm6, %v3809_v24, %v1171_v20  ;;  %v3801_v37 = vrot.slane %v1022_v29, 9 }
  0xd3   : > { %4291 = vmatpush3.bf16.xpose.msra.mxu0 %v2617_v48  ;;  %4398 = vmatprep.subr.msk.bf16.mxu1 %vm330_vm0, %v3826_v32  ;;  %v1178_v9 = vrot.slane %v5061_v49, 5  ;;  %v1181_v58 = vrot.slane %v5064_v52, 5  ;;  %v3802_v40 = vrot.slane %v1023_v50, 9  ;;  %v1115_v36 = vrot.slane %v5030_v22, 5  ;;  %v1025_v32 = vld [vmem:[%s4656_s23 + $0x54] sm:$0xe] }
  0xd4   : > { %4429 = vmatprep.subr.msk.bf16.mxu0 %vm330_vm0, %v4501_v19  ;;  %4306 = vmatprep.mubr.msk.bf16.mxu0 %vm330_vm0, %v5302_v17  ;;  %v1118_v27 = vrot.slane %v5035_v2, 5  ;;  %v1122_v63 = vrot.slane %v5077_v11, 5  ;;  %v1125_v46 = vrot.slane %v5083_v16, 5  ;;  %v3819_v54 = vcombine.low %v1109_v43, %v1112_v38  ;;  %v5421_v38 = vld [vmem:[%s4656_s23 + $0x1c] sm:$0xf] }
  0xd5   : > { %v1175_v41 = vsel %vm4884_vm6, %v1173_v35, %v1174_v47  ;;  %v5343_v49 = vsel %vm4884_vm6, %v3810_v8, %v1178_v9  ;;  %v1180_v52 = vrot.slane %v1178_v9, 4  ;;  %v3811_v48 = vrot.slane %v1032_v39, 9  ;;  %v4506_v9 = vld [vmem:[%s4656_s23 + $0x3c] sm:$0xff]  }
  0xd6   : > { %v5348_v22 = vsel %vm4884_vm6, %v3802_v40, %v1122_v63  ;;  %v1124_v2 = vrot.slane %v1122_v63, 4  ;;  %v1185_v11 = vrot.slane %v5102_v61, 5  ;;  %v1116_v16 = vsel %vm4884_vm6, %v3801_v37, %v1115_v36  ;;  %v4081_v37 = vld [vmem:[%s4656_s23 + $0x78] sm:$0xf]  ;;  %v4512_v63 = vld [vmem:[%s4656_s23 + $0x60] sm:$0xff]  }
  0xd7   : > { %v5355_v55 = vsel %vm4884_vm6, %v1180_v52, %v1181_v58  ;;  %v1188_v56 = vrot.slane %v5108_v6, 5  ;;  %v3803_v57 = vrot.slane %v1024_v31, 9  ;;  %v1117_v5 = vrot.slane %v1115_v36, 4  ;;  %v5431_v58 = vld [vmem:[%s4656_s23 + $0x7c] sm:$0xf]  ;;  %v4508_v36 = vld [vmem:[%s4656_s23 + $0x48] sm:$0xff]  }
  0xd8   : > { %v3829_v60 = vcombine.low %v5343_v49, %v5355_v55  ;;  %v5363_v1 = vsel %vm4884_vm6, %v1124_v2, %v1125_v46  ;;  %v5367_v61 = vsel %vm4884_vm6, %v3811_v48, %v1185_v11  ;;  %v1187_v4 = vrot.slane %v1185_v11, 4  ;;  %v5443_v11 = vld [vmem:[%s4656_s23 + $0x20] sm:$0x1] }
  0xd9   : > { %v3821_v6 = vcombine.low %v5348_v22, %v5363_v1  ;;  %v1129_v12 = vrot.slane %v5122_v34, 5  ;;  %v1132_v62 = vrot.slane %v5134_v44, 5  ;;  %v3812_v15 = vrot.slane %v1033_v59, 9 }
  0xda   : > { %4223 = vmatpush3.bf16.xpose.msra.mxu1 %v1263_v30  ;;  %v5378_v13 = vsel %vm4884_vm6, %v1187_v4, %v1188_v56  ;;  %v1192_v10 = vrot.slane %v5155_v45, 5  ;;  %v1195_v19 = vrot.slane %v5160_v42, 5  ;;  %v3828_v21 = vcombine.low %v5327_v18, %v1175_v41  ;;  %v4515_v56 = vld [vmem:[%s4656_s23 + $0xc] sm:$0xff]   ;;  %v4084_v4 = vld [vmem:[%s4656_s23 + $0x84] sm:$0xf] }
  0xdb   : > { %4293 = vmatpush3.bf16.xpose.msra.mxu0 %v2620_v25  ;;  %4399 = vmatprep.subr.msk.bf16.mxu1 %vm330_vm0, %v3827_v51  ;;  %v3830_v34 = vcombine.low %v5367_v61, %v5378_v13  ;;  %v5387_v44 = vsel %vm4884_vm6, %v3803_v57, %v1129_v12  ;;  %v1131_v23 = vrot.slane %v1129_v12, 4  ;;  %v3804_v45 = vrot.slane %v1025_v32, 9  ;;  %v4505_v51 = vld [vmem:[%s4656_s23 + $0x9c] sm:$0xff]  }
  0xdc   : > { %4430 = vmatprep.subr.msk.bf16.mxu0 %vm330_vm0, %v4503_v53  ;;  %v5391_v24 = vsel %vm4884_vm6, %v3812_v15, %v1192_v10  ;;  %v1194_v20 = vrot.slane %v1192_v10, 4  ;;  %v1136_v42 = vrot.slane %v5169_v3, 5  ;;  %v1266_v26 = vsel %vm330_vm0, %v3819_v54, 0  ;;  %v4507_v53 = vld [vmem:[%s4656_s23 + $0xa8] sm:$0xff]  }
  0xdd   : > { %v1119_v25 = vsel %vm4884_vm6, %v1117_v5, %v1118_v27  ;;  %v5399_v29 = vsel %vm4884_vm6, %v1131_v23, %v1132_v62  ;;  %v1139_v50 = vrot.slane %v5175_v14, 5  ;;  %v4057_v14 = vld [vmem:[%s4656_s23 + $0x18] sm:$0xf]  ;;  %v2769_v27 = vshll.u32 %v5421_v38, 16  ;;  %v5453_v62 = vld [vmem:[%s4656_s23 + $0x80] sm:$0x1] }
  0xde   : > { %v3822_v35 = vcombine.low %v5387_v44, %v5399_v29  ;;  %v5407_v3 = vsel %vm4884_vm6, %v1194_v20, %v1195_v19  ;;  %v5411_v47 = vsel %vm4884_vm6, %v3804_v45, %v1136_v42  ;;  %v1138_v8 = vrot.slane %v1136_v42, 4  ;;  %v5458_v10 = vld [vmem:[%s4656_s23 + $0x88] sm:$0xf]  ;;  %v4060_v45 = vld [vmem:[%s4656_s23 + $0x24] sm:$0xf] }
  0xdf   : > { %v3831_v30 = vcombine.low %v5391_v24, %v5407_v3  ;;  %v3820_v18 = vcombine.low %v1116_v16, %v1119_v25  ;;  %v2760_v40 = vshrl.u32 %v4057_v14, 16  ;;  %v2763_v31 = vshll.u32 %v4057_v14, 16  ;;  %6249 = vst [vmem:[#allocation2_spill] sm:$0xff] %v5458_v10 }
  0xe0   : > { %v5418_v43 = vsel %vm4884_vm6, %v1138_v8, %v1139_v50  ;;  %v2952_v46 = vshrl.u32 %v4081_v37, 16  ;;  %v2955_v54 = vshll.u32 %v4081_v37, 16  ;;  %v2773_v41 = vshrl.u32 %v5421_v38, 16  ;;  %v4519_v37 = vld [vmem:[%s4656_s23 + $0x18] sm:$0xff]  }
  0xe1   : > { %v3823_v39 = vcombine.low %v5411_v47, %v5418_v43  ;;  %v1269_v52 = vsel %vm330_vm0, %v3820_v18, 0  ;;  %v2961_v2 = vshll.u32 %v5431_v58, 16  ;;  %v2965_v48 = vshrl.u32 %v5431_v58, 16  ;;  %v4517_v18 = vld [vmem:[%s4656_s23 + $0x6c] sm:$0xff]   ;;  %v5546_v43 = vld [vmem:[%s4656_s23 + $0x34] sm:$0xf] }
  0xe2   : > { %4225 = vmatpush3.bf16.xpose.msra.mxu1 %v1266_v26  ;;  %v2626_v16 = vsel %vm330_vm0, %v4506_v9, 0  ;;  %v2762_v57 = vrot.slane %v2760_v40, 4  ;;  %v2765_v59 = vrot.slane %v2763_v31, 5  ;;  %v2629_v5 = vsel %vm330_vm0, %v4508_v36, 0 }
  0xe3   : > { %4295 = vmatpush3.bf16.xpose.msra.mxu0 %v5313_v28  ;;  %4400 = vmatprep.subr.msk.bf16.mxu1 %vm330_vm0, %v3828_v21  ;;  %v4510_v28 = vld [vmem:[%s4656_s23 + $0x54] sm:$0xff]   ;;  %v5455_v32 = vrot.slane %v2769_v27, 5  ;;  %v2775_v15 = vrot.slane %v2773_v41, 4  ;;  %v1272_v19 = vsel %vm330_vm0, %v3821_v6, 0  ;;  %v5465_v21 = vsel %vm330_vm0, %v4512_v63, 0 }
  0xe4   : > { %4431 = vmatprep.subr.msk.bf16.mxu0 %vm330_vm0, %v4505_v51  ;;  %v5450_v12 = vsel %vm330_vm0, %v4510_v28, 0  ;;  %v2954_v23 = vrot.slane %v2952_v46, 4  ;;  %v2957_v20 = vrot.slane %v2955_v54, 5  ;;  %v5472_v42 = vrot.slane %v2961_v2, 5  ;;  %v5476_v6 = vld [vmem:[%s4656_s23 + $0x28] sm:$0xf] }
  0xe5   : > { %v2967_v26 = vrot.slane %v2965_v48, 4  ;;  %v2779_v22 = vshll.u32 %v5443_v11, 16  ;;  %v2976_v1 = vshrl.u32 %v4084_v4, 16  ;;  %6250 = vst [vmem:[#allocation3_spill] sm:$0xff] %v5476_v6  ;;  %v5480_v25 = vsel %vm330_vm0, %v4515_v56, 0  ;;  %v4509_v28 = vld [vmem:[%s4656_s23 + $0xb4] sm:$0xff]  }
  0xe6   : > { %v2766_v50 = vor.u32 %v2765_v59, %v2762_v57  ;;  %v2979_v49 = vshll.u32 %v4084_v4, 16  ;;  %v2985_v55 = vshll.u32 %v5458_v10, 16  ;;  %v2989_v51 = vshrl.u32 %v5458_v10, 16  ;;  %v4087_v4 = vld [vmem:[%s4656_s23 + $0x90] sm:$0xf] }
  0xe7   : > { %v2784_v8 = vshrl.u32 %v4060_v45, 16  ;;  %v2787_v14 = vshll.u32 %v4060_v45, 16  ;;  %v2958_v9 = vor.u32 %v2957_v20, %v2954_v23  ;;  %v2971_v40 = vshll.u32 %v5453_v62, 16 }
  0xe8   : > { %v2793_v31 = vshll.u32 %v5476_v6, 16  ;;  %v2797_v36 = vshrl.u32 %v5476_v6, 16  ;;  %v2968_v27 = vor.u32 %v2967_v26, %v5472_v42  ;;  %v2781_v63 = vrot.slane %v2779_v22, 5  ;;  %v5507_v26 = vld [vmem:[%s4656_s23 + $0x8c] sm:$0x1] }
  0xe9   : > { %v2978_v46 = vrot.slane %v2976_v1, 4  ;;  %v2786_v54 = vrot.slane %v2784_v8, 4  ;;  %v2981_v41 = vrot.slane %v2979_v49, 5  ;;  %v5497_v57 = vrot.slane %v2985_v55, 5  ;;  %6252 = vst [vmem:[#allocation5_spill] sm:$0xff] %v5507_v26  ;;  %v4522_v8 = vld [vmem:[%s4656_s23 + $0x24] sm:$0xff]  }
  0xea   : > { %4227 = vmatpush3.bf16.xpose.msra.mxu1 %v1269_v52  ;;  %v5493_v52 = vld [vmem:[%s4656_s23 + $0x2c] sm:$0x1]  ;;  %v5495_v2 = vrot.slane %v2793_v31, 5  ;;  %v2799_v48 = vrot.slane %v2797_v36, 4  ;;  %v2991_v59 = vrot.slane %v2989_v51, 4  ;;  %v5504_v23 = vsel %vm330_vm0, %v4519_v37, 0 }
  0xeb   : > { %4297 = vmatpush3.bf16.xpose.msra.mxu0 %v2626_v16  ;;  %4401 = vmatprep.subr.msk.bf16.mxu1 %vm330_vm0, %v3829_v60  ;;  %v2776_v60 = vor.u32 %v2775_v15, %v5455_v32  ;;  %6251 = vst [vmem:[#allocation4_spill] sm:$0xff] %v5493_v52  ;;  %v2767_v16 = vrot.slane %v2766_v50, 4  ;;  %v5501_v15 = vsel %vm330_vm0, %v4517_v18, 0  ;;  %v2959_v20 = vrot.slane %v2958_v9, 4  ;;  %v5516_v49 = vld [vmem:[%s4656_s23 + $0x94] sm:$0xf] }
  0xec   : > { %4432 = vmatprep.subr.msk.bf16.mxu0 %vm330_vm0, %v4507_v53  ;;  %v2789_v53 = vrot.slane %v2787_v14, 5  ;;  %v2973_v45 = vrot.slane %v2971_v40, 5  ;;  %v2969_v22 = vrot.slane %v2968_v27, 4  ;;  %v2803_v50 = vshll.u32 %v5493_v52, 16  ;;  %v4063_v18 = vld [vmem:[%s4656_s23 + $0x30] sm:$0xf] }
  0xed   : > { %v2777_v56 = vrot.slane %v2776_v60, 4  ;;  %v2982_v61 = vor.u32 %v2981_v41, %v2978_v46  ;;  %v3000_v13 = vshrl.u32 %v4087_v4, 16  ;;  %v2772_v55 = vsel %vm4691_vm3, %v2767_v16, %v5455_v32 }
  0xee   : > { %v2790_v1 = vor.u32 %v2789_v53, %v2786_v54  ;;  %v2992_v51 = vor.u32 %v2991_v59, %v5497_v57  ;;  %v2995_v44 = vshll.u32 %v5507_v26, 16  ;;  %v5534_v29 = vsel %vm330_vm0, %v3823_v39, 0  ;;  %v4511_v39 = vld [vmem:[%s4656_s23 + $0xc0] sm:$0xff]   ;;  %v5557_v54 = vld [vmem:[%s4656_s23 + $0x98] sm:$0x1] }
  0xef   : > { %v2782_v60 = vsel %vm4691_vm3, %v2777_v56, %v2781_v63  ;;  %v3009_v32 = vshll.u32 %v5516_v49, 16  ;;  %v3013_v14 = vshrl.u32 %v5516_v49, 16  ;;  %v2974_v37 = vsel %vm4691_vm3, %v2969_v22, %v2973_v45  ;;  %v5667_v26 = vld [vmem:[%s4656_s23 + $0xb0] sm:$0x1] }
  0xf0   : > { %v2791_v9 = vrot.slane %v2790_v1, 4  ;;  %v2805_v47 = vrot.slane %v2803_v50, 5  ;;  %v4108_v31 = vcombine.low %v2772_v55, %v2782_v60  ;;  %v5549_v36 = vrot.slane %v2982_v61, 4  ;;  %v4066_v1 = vld [vmem:[%s4656_s23 + $0x3c] sm:$0xf] }
  0xf1   : > { %v5552_v63 = vrot.slane %v2992_v51, 4  ;;  %v5554_v46 = vrot.slane %v2995_v44, 5  ;;  %v2808_v41 = vshrl.u32 %v4063_v18, 16  ;;  %v2811_v53 = vshll.u32 %v4063_v18, 16  ;;  %v5608_v44 = vld [vmem:[%s4656_s23 + $0xa0] sm:$0xf] }
  0xf2   : > { %4229 = vmatpush3.bf16.xpose.msra.mxu1 %v1272_v19  ;;  %v2800_v19 = vor.u32 %v2799_v48, %v5495_v2  ;;  %v5560_v48 = vsel %vm330_vm0, %v4522_v8, 0  ;;  %v5562_v16 = vrot.slane %v3009_v32, 5  ;;  %v3015_v56 = vrot.slane %v3013_v14, 4  ;;  %v4514_v8 = vld [vmem:[%s4656_s23 + $0x6c] sm:$0xff]  }
  0xf3   : > { %4299 = vmatpush3.bf16.xpose.msra.mxu0 %v2629_v5  ;;  %4402 = vmatprep.subr.msk.bf16.mxu1 %vm330_vm0, %v3830_v34  ;;  %v1275_v5 = vsel %vm330_vm0, %v3822_v35, 0  ;;  %v3003_v34 = vshll.u32 %v4087_v4, 16  ;;  %v2964_v35 = vsel %vm4691_vm3, %v2959_v20, %v5472_v42  ;;  %v4524_v42 = vld [vmem:[%s4656_s23 + $0x30] sm:$0xff]   ;;  %v2817_v59 = vshll.u32 %v5546_v43, 16 }
  0xf4   : > { %4433 = vmatprep.subr.msk.bf16.mxu0 %vm330_vm0, %v4509_v28  ;;  %v2801_v40 = vrot.slane %v2800_v19, 4  ;;  %v3002_v28 = vrot.slane %v3000_v13, 4  ;;  %v5570_v4 = vcombine.low %v2964_v35, %v2974_v37  ;;  %v2796_v20 = vsel %vm4691_vm3, %v2791_v9, %v5495_v2  ;;  %v5589_v2 = vld [vmem:[%s4656_s23 + $0x38] sm:$0x1]  ;;  %v4090_v19 = vld [vmem:[%s4656_s23 + $0x9c] sm:$0xf] }
  0xf5   : > { %v3005_v27 = vrot.slane %v3003_v34, 5  ;;  %v2821_v22 = vshrl.u32 %v5546_v43, 16  ;;  %v5581_v24 = vsel %vm330_vm0, %v4108_v31, 0  ;;  %v2810_v61 = vrot.slane %v2808_v41, 4  ;;  %v5600_v34 = vld [vmem:[%s4656_s23 + $0x40] sm:$0xf] }
  0xf6   : > { %v2806_v45 = vsel %vm4691_vm3, %v2801_v40, %v2805_v47  ;;  %v2813_v13 = vrot.slane %v2811_v53, 5  ;;  %v3016_v60 = vor.u32 %v3015_v56, %v5562_v16  ;;  %v5605_v51 = vrot.slane %v2817_v59, 5  ;;  %v4516_v9 = vld [vmem:[%s4656_s23 + $0xcc] sm:$0xff]   ;;  %v4093_v53 = vld [vmem:[%s4656_s23 + $0xa8] sm:$0xf] }
  0xf7   : > { %v5602_v55 = vcombine.low %v2796_v20, %v2806_v45  ;;  %v2832_v35 = vshrl.u32 %v4066_v1, 16  ;;  %v2823_v32 = vrot.slane %v2821_v22, 4  ;;  %v3024_v14 = vshrl.u32 %v4090_v19, 16  ;;  %v5628_v22 = vld [vmem:[%s4656_s23 + $0xac] sm:$0xf] }
  0xf8   : > { %v3027_v18 = vshll.u32 %v4090_v19, 16  ;;  %v2835_v37 = vshll.u32 %v4066_v1, 16  ;;  %v2841_v31 = vshll.u32 %v5600_v34, 16  ;;  %v2845_v41 = vshrl.u32 %v5600_v34, 16  ;;  %v5634_v19 = vld [vmem:[%s4656_s23 + $0x44] sm:$0x1] }
  0xf9   : > { %v5623_v56 = vrot.slane %v3016_v60, 4  ;;  %v2834_v59 = vrot.slane %v2832_v35, 4  ;;  %v2824_v1 = vor.u32 %v2823_v32, %v5605_v51  ;;  %v3048_v60 = vshrl.u32 %v4093_v53, 16 }
  0xfa   : > { %4231 = vmatpush3.bf16.xpose.msra.mxu1 %v1275_v5  ;;  %v5597_v5 = vsel %vm330_vm0, %v4524_v42, 0  ;;  %v2814_v42 = vor.u32 %v2813_v13, %v2810_v61  ;;  %v2837_v20 = vrot.slane %v2835_v37, 5  ;;  %v5625_v45 = vrot.slane %v2841_v31, 5  ;;  %v5642_v13 = vld [vmem:[%s4656_s23 + $0xa4] sm:$0x1] }
  0xfb   : > { %4301 = vmatpush3.bf16.xpose.msra.mxu0 %v5450_v12  ;;  %4403 = vmatprep.subr.msk.bf16.mxu1 %vm330_vm0, %v3831_v30  ;;  %v3006_v30 = vor.u32 %v3005_v27, %v3002_v28  ;;  %v3019_v12 = vshll.u32 %v5557_v54, 16  ;;  %v3033_v28 = vshll.u32 %v5608_v44, 16  ;;  %v3037_v27 = vshrl.u32 %v5608_v44, 16  ;;  %v4069_v37 = vld [vmem:[%s4656_s23 + $0x48] sm:$0xf] }
  0xfc   : > { %4434 = vmatprep.subr.msk.bf16.mxu0 %vm330_vm0, %v4511_v39  ;;  %v2827_v39 = vshll.u32 %v5589_v2, 16  ;;  %v3051_v35 = vshll.u32 %v4093_v53, 16  ;;  %v2838_v31 = vor.u32 %v2837_v20, %v2834_v59  ;;  %v3050_v53 = vrot.slane %v3048_v60, 4 }
  0xfd   : > { %v5612_v40 = vrot.slane %v3006_v30, 4  ;;  %v5614_v47 = vrot.slane %v3019_v12, 5  ;;  %v3026_v30 = vrot.slane %v3024_v14, 4  ;;  %v3029_v12 = vrot.slane %v3027_v18, 5 }
  0xfe   : > { %v5644_v32 = vrot.slane %v3033_v28, 5  ;;  %v3039_v14 = vrot.slane %v3037_v27, 4  ;;  %v3057_v18 = vshll.u32 %v5628_v22, 16  ;;  %v2825_v28 = vrot.slane %v2824_v1, 4 }
  0xff   : > { %v3012_v61 = vsel %vm4691_vm3, %v5612_v40, %v5562_v16  ;;  %v3061_v16 = vshrl.u32 %v5628_v22, 16  ;;  %v5652_v40 = vld [vmem:[%s4656_s23 + $0x4c] sm:$0xf]  ;;  %v3030_v27 = vor.u32 %v3029_v12, %v3026_v30  ;;  %v3053_v3 = vrot.slane %v3051_v35, 5 }
 0x100   : > { %v5660_v59 = vrot.slane %v3057_v18, 5  ;;  %v2859_v50 = vshll.u32 %v4069_v37, 16  ;;  %v3040_v52 = vor.u32 %v3039_v14, %v5644_v32  ;;  %v3043_v6 = vshll.u32 %v5642_v13, 16  ;;  %v4526_v18 = vld [vmem:[%s4656_s23 + $0x3c] sm:$0xff]  }
 0x101   : > { %v3063_v20 = vrot.slane %v3061_v16, 4  ;;  %v2865_v1 = vshll.u32 %v5652_v40, 16  ;;  %v2869_v30 = vshrl.u32 %v5652_v40, 16  ;;  %v3022_v12 = vsel %vm4691_vm3, %v5623_v56, %v5614_v47  ;;  %v4521_v16 = vld [vmem:[%s4656_s23 + $0x84] sm:$0xff]  }
 0x102   : > { %4233 = vmatpush3.bf16.xpose.msra.mxu1 %v5534_v29  ;;  %v2847_v29 = vrot.slane %v2845_v41, 4  ;;  %v2851_v41 = vshll.u32 %v5634_v19, 16  ;;  %v2839_v60 = vrot.slane %v2838_v31, 4  ;;  %v3031_v47 = vrot.slane %v3030_v27, 4  ;;  %v4096_v27 = vld [vmem:[%s4656_s23 + $0xb4] sm:$0xf] }
 0x103   : > { %4303 = vmatpush3.bf16.xpose.msra.mxu0 %v5465_v21  ;;  %4404 = vmatprep.subr.msk.bf16.mxu1 %vm330_vm0, %v4514_v8  ;;  %v2829_v21 = vrot.slane %v2827_v39, 5  ;;  %v2815_v8 = vrot.slane %v2814_v42, 4  ;;  %v5657_v39 = vld [vmem:[%s6229_s1 + $0x18] sm:$0x3f]   ;;  %v3054_v56 = vor.u32 %v3053_v3, %v3050_v53  ;;  %v6254_v3 = vsel %vm4691_vm3, %v5552_v63, %v5554_v46 }
 0x104   : > { %4435 = vmatprep.subr.msk.bf16.mxu0 %vm330_vm0, %v4516_v9  ;;  %v2848_v9 = vor.u32 %v2847_v29, %v5625_v45  ;;  %6253 = vst [vmem:[#allocation6_spill] sm:$0xff] %v5657_v39  ;;  %v4518_v42 = vld [vmem:[%s4656_s23 + $0x78] sm:$0xff]   ;;  %v2856_v29 = vshrl.u32 %v4069_v37, 16  ;;  %v2853_v35 = vrot.slane %v2851_v41, 5  ;;  %v3064_v37 = vor.u32 %v3063_v20, %v5660_v59 }
 0x105   : > { %v2830_v14 = vsel %vm4691_vm3, %v2825_v28, %v2829_v21  ;;  %v3041_v41 = vrot.slane %v3040_v52, 4  ;;  %v2871_v21 = vrot.slane %v2869_v30, 4  ;;  %v5705_v52 = vsel %vm330_vm0, %v5602_v55, 0  ;;  %v5713_v28 = vld [vmem:[%s4656_s23 + $0x50] sm:$0x1] }
 0x106   : > { %v2858_v31 = vrot.slane %v2856_v29, 4  ;;  %v5715_v63 = vcombine.low %v3012_v61, %v3022_v12  ;;  %v5722_v55 = vld [vmem:[%s4656_s23 + $0xb8] sm:$0xf]  ;;  %v3065_v53 = vrot.slane %v3064_v37, 4 }
 0x107   : > { %v5731_v61 = vld [vmem:[%s6229_s1 + $0x38] sm:$0x3f]  }
 0x108   : > { %6256 = vst [vmem:[#allocation7_spill] sm:$0xff] %v5731_v61 }
 0x109   : > { %4235 = vmatmul.mubr.msk.bf16.vlgmr.msra.gmra.mrb[0].mxu1 %vm330_vm0, %v5252_v0  ;;  %v2849_v0 = vrot.slane %v2848_v9, 4  ;;  %v2861_v9 = vrot.slane %v2859_v50, 5 }
 0x10a   : > { %4237 = vmatpush3.bf16.xpose.msra.mxu1 %v5480_v25  ;;  %4252 = vmatprep.mubr.msk.bf16.mxu1 %vm330_vm0, %v5657_v39  ;;  %v2820_v25 = vsel %vm4691_vm3, %v2815_v8, %v5605_v51  ;;  %v3045_v51 = vrot.slane %v3043_v6, 5  ;;  %v5690_v8 = vrot.slane %v2865_v1, 5  ;;  %v2844_v6 = vsel %vm4691_vm3, %v2839_v60, %v5625_v45  ;;  %v4072_v1 = vld [vmem:[%s4656_s23 + $0x54] sm:$0xf] }
 0x10b   : > { %4305 = vmatpush3.bf16.xpose.msra.mxu0 %v5501_v15  ;;  %4405 = vmatprep.subr.msk.bf16.mxu1 %vm330_vm0, %v4518_v42  ;;  %v3067_v15 = vshll.u32 %v5667_v26, 16  ;;  %v2854_v50 = vsel %vm4691_vm3, %v2849_v0, %v2853_v35  ;;  %v4110_v46 = vcombine.low %v2820_v25, %v2830_v14  ;;  %v3036_v45 = vsel %vm4691_vm3, %v3031_v47, %v5644_v32  ;;  %v5738_v35 = vld [vmem:[%s4656_s23 + $0x58] sm:$0xf] }
 0x10c   : > { %4436 = vmatprep.subr.msk.bf16.mxu0 %vm330_vm0, %v5570_v4  ;;  %v6255_v4 = vsel %vm4691_vm3, %v5549_v36, %v5497_v57  ;;  %v5718_v57 = vsel %vm330_vm0, %v4526_v18, 0  ;;  %v3055_v36 = vrot.slane %v3054_v56, 4  ;;  %v2862_v29 = vor.u32 %v2861_v9, %v2858_v31  ;;  %6257 = vst [vmem:[#allocation8_spill] sm:$0xff] %v5738_v35 }
 0x10d   : > { %v4117_v42 = vcombine.low %v6255_v4, %v6254_v3  ;;  %v3069_v20 = vrot.slane %v3067_v15, 5  ;;  %v3046_v30 = vsel %vm4691_vm3, %v3041_v41, %v3045_v51  ;;  %v4111_v12 = vcombine.low %v2844_v6, %v2854_v50  ;;  %v4099_v41 = vld [vmem:[%s4656_s23 + $0xc0] sm:$0xf]  ;;  %v5776_v3 = vld [vmem:[%s4656_s23 + $0xc4] sm:$0xf] }
 0x10e   : > { %v2872_v60 = vor.u32 %v2871_v21, %v5690_v8  ;;  %v2875_v0 = vshll.u32 %v5713_v28, 16  ;;  %v3072_v32 = vshrl.u32 %v4096_v27, 16  ;;  %v3075_v25 = vshll.u32 %v4096_v27, 16  ;;  %6259 = vst [vmem:[#allocation10_spill] sm:$0xff] %v5776_v3 }
 0x10f   : > { %v3081_v14 = vshll.u32 %v5722_v55, 16  ;;  %v3085_v18 = vshrl.u32 %v5722_v55, 16  ;;  %v5748_v47 = vsel %vm330_vm0, %v4110_v46, 0  ;;  %v2880_v56 = vshrl.u32 %v4072_v1, 16  ;;  %v4075_v46 = vld [vmem:[%s4656_s23 + $0x60] sm:$0xf] }
 0x110   : > { %v2883_v37 = vshll.u32 %v4072_v1, 16  ;;  %v5759_v15 = vrot.slane %v2862_v29, 4  ;;  %v2889_v31 = vshll.u32 %v5738_v35, 16  ;;  %v2893_v9 = vshrl.u32 %v5738_v35, 16  ;;  %v5819_v1 = vld [vmem:[%s4656_s23 + $0x68] sm:$0x1] }
 0x111   : > { %v5769_v51 = vsel %vm330_vm0, %v4111_v12, 0  ;;  %v5771_v21 = vrot.slane %v2872_v60, 4  ;;  %v5778_v4 = vrot.slane %v3072_v32, 4  ;;  %v5782_v6 = vrot.slane %v3081_v14, 5  ;;  %6262 = vst [vmem:[#allocation13_spill] sm:$0xff] %v5819_v1 }
 0x112   : > { %4239 = vmatpush3.bf16.xpose.msra.mxu1 %v5504_v23  ;;  %4307 = vmatmul.mubr.msk.bf16.vlgmr.msra.gmra.mrb[0].mxu0 %vm330_vm0, %v5302_v17  ;;  %v3060_v23 = vsel %vm4691_vm3, %v3055_v36, %v5660_v59  ;;  %v5754_v17 = vld [vmem:[%s4656_s23 + $0xbc] sm:$0x1]  ;;  %v5766_v59 = vcombine.low %v3036_v45, %v3046_v30  ;;  %v5784_v50 = vrot.slane %v3085_v18, 4  ;;  %v4523_v36 = vld [vmem:[%s4656_s23 + $0x90] sm:$0xff]   ;;  %v2885_v29 = vrot.slane %v2883_v37, 5 }
 0x113   : > { %4309 = vmatpush3.bf16.xpose.msra.mxu0 %v5581_v24  ;;  %4406 = vmatprep.subr.msk.bf16.mxu1 %vm330_vm0, %v4521_v16  ;;  %6258 = vst [vmem:[#allocation9_spill] sm:$0xff] %v5754_v17  ;;  %v3070_v24 = vsel %vm4691_vm3, %v3065_v53, %v3069_v20  ;;  %v5773_v16 = vrot.slane %v2875_v0, 5  ;;  %v3091_v45 = vshll.u32 %v5754_v17, 16  ;;  %v5792_v53 = vld [vmem:[%s4656_s23 + $0x5c] sm:$0x1]  ;;  %v2882_v20 = vrot.slane %v2880_v56, 4 }
 0x114   : > { %4437 = vmatprep.subr.msk.bf16.mxu0 %vm330_vm0, %v4117_v42  ;;  %4324 = vmatprep.mubr.msk.bf16.mxu0 %vm330_vm0, %v5731_v61  ;;  %v5780_v42 = vrot.slane %v3075_v25, 5  ;;  %v5788_v27 = vcombine.low %v3060_v23, %v3070_v24  ;;  %6260 = vst [vmem:[#allocation11_spill] sm:$0xff] %v5792_v53  ;;  %v5798_v30 = vrot.slane %v2889_v31, 5  ;;  %v2895_v12 = vrot.slane %v2893_v9, 4  ;;  %v5801_v0 = vld [vmem:[%s4656_s23 + $0x64] sm:$0xf] }
 0x115   : > { %v3096_v60 = vshrl.u32 %v4099_v41, 16  ;;  %6261 = vst [vmem:[#allocation12_spill] sm:$0xff] %v5801_v0  ;;  %v3099_v25 = vshll.u32 %v4099_v41, 16  ;;  %v3105_v14 = vshll.u32 %v5776_v3, 16  ;;  %v2904_v18 = vshrl.u32 %v4075_v46, 16 }
 0x116   : > { %v3078_v23 = vor.u32 %v5780_v42, %v5778_v4  ;;  %v3088_v56 = vor.u32 %v5784_v50, %v5782_v6  ;;  %v3109_v37 = vshrl.u32 %v5776_v3, 16  ;;  %v2907_v24 = vshll.u32 %v4075_v46, 16  ;;  %v4102_v31 = vld [vmem:[%s4656_s23 + $0xcc] sm:$0xf]  ;;  %v5826_v50 = vld [vmem:[%s4656_s23 + $0xc8] sm:$0x1] }
 0x117   : > { %v2886_v9 = vor.u32 %v2885_v29, %v2882_v20  ;;  %v2899_v41 = vshll.u32 %v5792_v53, 16  ;;  %v2913_v4 = vshll.u32 %v5801_v0, 16  ;;  %v2896_v42 = vor.u32 %v2895_v12, %v5798_v30  ;;  %v4525_v3 = vld [vmem:[%s4656_s23 + $0x9c] sm:$0xff]   ;;  %v4078_v17 = vld [vmem:[%s4656_s23 + $0x6c] sm:$0xf] }
 0x118   : > { %v2909_v46 = vrot.slane %v2907_v24, 5  ;;  %v3101_v20 = vrot.slane %v3099_v25, 5  ;;  %v5829_v29 = vrot.slane %v3105_v14, 5  ;;  %v3120_v61 = vshrl.u32 %v4102_v31, 16 }
 0x119   : > { %v5831_v32 = vrot.slane %v2913_v4, 5  ;;  %v3111_v39 = vrot.slane %v3109_v37, 4  ;;  %v2923_v12 = vshll.u32 %v5819_v1, 16  ;;  %v2887_v24 = vrot.slane %v2886_v9, 4  ;;  %v5853_v1 = vld [vmem:[%s4656_s23 + $0x70] sm:$0xf] }
 0x11a   : > { %4241 = vmatpush3.bf16.xpose.msra.mxu1 %v5560_v48  ;;  %v2906_v48 = vrot.slane %v2904_v18, 4  ;;  %v5834_v18 = vld [vmem:[%s4656_s23 + $0xd0] sm:$0xf]  ;;  %v3123_v25 = vshll.u32 %v4102_v31, 16  ;;  %v2897_v14 = vrot.slane %v2896_v42, 4  ;;  %v3115_v4 = vshll.u32 %v5826_v50, 16 }
 0x11b   : > { %4311 = vmatpush3.bf16.xpose.msra.mxu0 %v5705_v52  ;;  %4407 = vmatprep.subr.msk.bf16.mxu1 %vm330_vm0, %v4523_v36  ;;  %v3098_v52 = vrot.slane %v3096_v60, 4  ;;  %v2917_v36 = vshrl.u32 %v5801_v0, 16  ;;  %v5838_v60 = vrot.slane %v3091_v45, 5  ;;  %v2901_v0 = vrot.slane %v2899_v41, 5  ;;  %6263 = vst [vmem:[#allocation14_spill] sm:$0xff] %v5853_v1 }
 0x11c   : > { %4438 = vmatprep.subr.msk.bf16.mxu0 %vm330_vm0, %v5715_v63  ;;  %v2910_v63 = vor.u32 %v2909_v46, %v2906_v48  ;;  %v3129_v35 = vshll.u32 %v5834_v18, 16  ;;  %v5845_v48 = vld [vmem:[%s4656_s23 + $0xd4] sm:$0x1]  ;;  %v3122_v46 = vrot.slane %v3120_v61, 4  ;;  %v3133_v45 = vshrl.u32 %v5834_v18, 16 }
 0x11d   : > { %v2919_v10 = vrot.slane %v2917_v36, 4  ;;  %v3102_v37 = vor.u32 %v3101_v20, %v3098_v52  ;;  %v3125_v36 = vrot.slane %v3123_v25, 5  ;;  %v3112_v31 = vor.u32 %v3111_v39, %v5829_v29 }
 0x11e   : > { %v2911_v9 = vrot.slane %v2910_v63, 4  ;;  %v2925_v41 = vrot.slane %v2923_v12, 5  ;;  %v5850_v42 = vrot.slane %v3129_v35, 5  ;;  %v3135_v61 = vrot.slane %v3133_v45, 4  ;;  %v4528_v12 = vld [vmem:[%s4656_s23 + $0x48] sm:$0xff]  }
 0x11f   : > { %v2920_v53 = vor.u32 %v2919_v10, %v5831_v32  ;;  %v2928_v52 = vshrl.u32 %v4078_v17, 16  ;;  %v2931_v20 = vshll.u32 %v4078_v17, 16  ;;  %v3089_v39 = vrot.slane %v3088_v56, 4  ;;  %v4527_v45 = vld [vmem:[%s4656_s23 + $0xa8] sm:$0xff]  }
 0x120   : > { %v2892_v35 = vsel %vm4691_vm3, %v2887_v24, %v5798_v30  ;;  %v3126_v63 = vor.u32 %v3125_v36, %v3122_v46  ;;  %v2941_v17 = vshrl.u32 %v5853_v1, 16  ;;  %v3113_v56 = vrot.slane %v3112_v31, 4  ;;  %v4530_v30 = vld [vmem:[%s4656_s23 + $0x54] sm:$0xff]   ;;  %v4532_v31 = vld [vmem:[%s4656_s23 + $0x60] sm:$0xff]  }
 0x121   : > { %v2921_v10 = vrot.slane %v2920_v53, 4  ;;  %v2937_v53 = vshll.u32 %v5853_v1, 16  ;;  %v3117_v25 = vrot.slane %v3115_v4, 5  ;;  %v2916_v24 = vsel %vm4691_vm3, %v2911_v9, %v5831_v32  ;;  %v5877_v36 = vld [vmem:[%s4656_s23 + $0x74] sm:$0x1] }
 0x122   : > { %4243 = vmatpush3.bf16.xpose.msra.mxu1 %v5597_v5  ;;  %v3079_v5 = vrot.slane %v3078_v23, 4  ;;  %v3103_v23 = vrot.slane %v3102_v37, 4  ;;  %v2933_v1 = vrot.slane %v2931_v20, 5  ;;  %v3094_v37 = vsel %vm4691_vm3, %v3089_v39, %v5838_v60 }
 0x123   : > { %4313 = vmatpush3.bf16.xpose.msra.mxu0 %v5748_v47  ;;  %4408 = vmatprep.subr.msk.bf16.mxu1 %vm330_vm0, %v4525_v3  ;;  %v3139_v47 = vshll.u32 %v5845_v48, 16  ;;  %v3136_v3 = vor.u32 %v3135_v61, %v5850_v42  ;;  %v2926_v46 = vsel %vm4691_vm3, %v2921_v10, %v2925_v41  ;;  %v2930_v61 = vrot.slane %v2928_v52, 4  ;;  %v4133_v52 = vld [vmem:[%s4656_s23 + $0x78] sm:$0xe] }
 0x124   : > { %4439 = vmatprep.subr.msk.bf16.mxu0 %vm330_vm0, %v5766_v59  ;;  %v2902_v59 = vsel %vm4691_vm3, %v2897_v14, %v2901_v0  ;;  %v6264_v0 = vsel %vm4691_vm3, %v5771_v21, %v5773_v16  ;;  %v6265_v14 = vsel %vm4691_vm3, %v5759_v15, %v5690_v8  ;;  %v3084_v32 = vsel %vm4691_vm3, %v3079_v5, %v5782_v6 }
 0x125   : > { %v4112_v4 = vcombine.low %v6265_v14, %v6264_v0  ;;  %v3141_v9 = vrot.slane %v3139_v47, 5  ;;  %v3127_v41 = vrot.slane %v3126_v63, 4  ;;  %v3137_v10 = vrot.slane %v3136_v3, 4 }
 0x126   : > { %v5896_v21 = vrot.slane %v2937_v53, 5  ;;  %v2943_v16 = vrot.slane %v2941_v17, 4  ;;  %v1494_v8 = vsel %vm330_vm0, %v4528_v12, 0  ;;  %v4113_v15 = vcombine.low %v2892_v35, %v2902_v59  ;;  %v5913_v35 = vld [vmem:[%s4656_s23 + $0x18] sm:$0xe] }
 0x127   : > { %v4114_v6 = vcombine.low %v2916_v24, %v2926_v46  ;;  %v2947_v20 = vshll.u32 %v5877_v36, 16  ;;  %v5905_v60 = vsel %vm330_vm0, %v4530_v30, 0  ;;  %v3108_v5 = vsel %vm4691_vm3, %v3103_v23, %v5829_v29  ;;  %v4135_v53 = vld [vmem:[%s4656_s23 + $0x90] sm:$0xe] }
 0x128   : > { %v2934_v39 = vor.u32 %v2933_v1, %v2930_v61  ;;  %v4121_v47 = vcombine.low %v3084_v32, %v3094_v37  ;;  %v5919_v63 = vsel %vm330_vm0, %v4532_v31, 0  ;;  %v4149_v3 = vrot.slane %v4133_v52, 9 }
 0x129   : > { %v3132_v29 = vsel %vm4691_vm3, %v3127_v41, %v5850_v42  ;;  %v3142_v1 = vsel %vm4691_vm3, %v3137_v10, %v3141_v9  ;;  %v2944_v17 = vor.u32 %v2943_v16, %v5896_v21  ;;  %v5930_v12 = vsel %vm330_vm0, %v4113_v15, 0  ;;  %v4529_v42 = vld [vmem:[%s4656_s23 + $0xb4] sm:$0xff]   ;;  %v4128_v16 = vld [vmem:[%s4656_s23 + $0x3c] sm:$0xe] }
 0x12a   : > { %4245 = vmatpush3.bf16.xpose.msra.mxu1 %v5718_v57  ;;  %v3118_v57 = vsel %vm4691_vm3, %v3113_v56, %v3117_v25  ;;  %v5935_v23 = vsel %vm330_vm0, %v4114_v6, 0  ;;  %v5937_v56 = vrot.slane %v2947_v20, 5  ;;  %v4127_v25 = vld [vmem:[%s4656_s23 + $0x30] sm:$0xe]  ;;  %v3422_v30 = vrot.slane %v5453_v62, 5 }
 0x12b   : > { %4315 = vmatpush3.bf16.xpose.msra.mxu0 %v5769_v51  ;;  %4409 = vmatprep.subr.msk.bf16.mxu1 %vm330_vm0, %v4527_v45  ;;  %v3215_v51 = vsel %vm330_vm0, %v4112_v4, 0  ;;  %v5932_v59 = vcombine.low %v3108_v5, %v3118_v57  ;;  %v5941_v45 = vrot.slane %v2934_v39, 4  ;;  %v4141_v24 = vrot.slane %v5913_v35, 9  ;;  %v4136_v4 = vld [vmem:[%s4656_s23 + $0x9c] sm:$0xe] }
 0x12c   : > { %4440 = vmatprep.subr.msk.bf16.mxu0 %vm330_vm0, %v5788_v27  ;;  %v3419_v27 = vrot.slane %v5431_v58, 5  ;;  %v4151_v58 = vrot.slane %v4135_v53, 9  ;;  %v5945_v46 = vcombine.low %v3132_v29, %v3142_v1  ;;  %v3363_v61 = vrot.slane %v5421_v38, 5  ;;  %v4129_v1 = vld [vmem:[%s4656_s23 + $0x48] sm:$0xe] }
 0x12d   : > { %v3433_v0 = vrot.slane %v5516_v49, 5  ;;  %v3436_v14 = vrot.slane %v5557_v54, 5  ;;  %v5951_v32 = vrot.slane %v2944_v17, 4  ;;  %v4143_v9 = vrot.slane %v4127_v25, 9  ;;  %v4531_v17 = vld [vmem:[%s4656_s23 + $0xc0] sm:$0xff]  }
 0x12e   : > { %v5955_v37 = vsel %vm4884_vm6, %v4149_v3, %v3419_v27  ;;  %v3421_v31 = vrot.slane %v3419_v27, 4  ;;  %v3377_v49 = vrot.slane %v5546_v43, 5  ;;  %v3380_v54 = vrot.slane %v5589_v2, 5 }
 0x12f   : > { %v5959_v41 = vsel %vm4884_vm6, %v4151_v58, %v3433_v0  ;;  %v3435_v10 = vrot.slane %v3433_v0, 4  ;;  %v2940_v52 = vsel %vm4691_vm3, %v5941_v45, %v5896_v21  ;;  %v3440_v15 = vrot.slane %v5608_v44, 5  ;;  %v4137_v44 = vld [vmem:[%s4656_s23 + $0xa8] sm:$0xe]  ;;  %v4138_v0 = vld [vmem:[%s4656_s23 + $0xb4] sm:$0xe] }
 0x130   : > { %v3443_v6 = vrot.slane %v5642_v13, 5  ;;  %v5974_v43 = vrot.slane %v3363_v61, 4  ;;  %v5982_v20 = vsel %vm4884_vm6, %v4143_v9, %v3377_v49  ;;  %v3379_v5 = vrot.slane %v3377_v49, 4 }
 0x131   : > { %v5978_v2 = vsel %vm4884_vm6, %v3435_v10, %v3436_v14  ;;  %v3442_v39 = vrot.slane %v3440_v15, 4  ;;  %v3384_v53 = vrot.slane %v5600_v34, 5  ;;  %v3387_v29 = vrot.slane %v5634_v19, 5 }
 0x132   : > { %4247 = vmatpush3.bf16.xpose.msra.mxu1 %v1494_v8  ;;  %v4152_v8 = vrot.slane %v4136_v4, 9  ;;  %v4170_v13 = vcombine.low %v5959_v41, %v5978_v2  ;;  %v5994_v3 = vsel %vm4884_vm6, %v3379_v5, %v3380_v54  ;;  %v3447_v58 = vrot.slane %v5628_v22, 5  ;;  %v4130_v54 = vld [vmem:[%s4656_s23 + $0x54] sm:$0xe] }
 0x133   : > { %4317 = vmatpush3.bf16.xpose.msra.mxu0 %v3215_v51  ;;  %4410 = vmatprep.subr.msk.bf16.mxu1 %vm330_vm0, %v4529_v42  ;;  %v4144_v51 = vrot.slane %v4128_v16, 9  ;;  %v4162_v27 = vcombine.low %v5982_v20, %v5994_v3  ;;  %v6004_v25 = vsel %vm4884_vm6, %v3442_v39, %v3443_v6  ;;  %v4153_v42 = vrot.slane %v4137_v44, 9  ;;  %v6266_v6 = vld [vmem:[#allocation9_spill] sm:$0xff] }
 0x134   : > { %4441 = vmatprep.subr.msk.bf16.mxu0 %vm330_vm0, %v4121_v47  ;;  %v5989_v57 = vsel %vm4884_vm6, %v4152_v8, %v3440_v15  ;;  %v3366_v47 = vrot.slane %v5443_v11, 5  ;;  %v3386_v19 = vrot.slane %v3384_v53, 4  ;;  %v3450_v4 = vrot.slane %v5667_v26, 5  ;;  %v196_v11 = vld [vmem:[%s6230_s2] sm:$0xff] }
 0x135   : > { %v4171_v14 = vcombine.low %v5989_v57, %v6004_v25  ;;  %v6012_v34 = vsel %vm4884_vm6, %v4144_v51, %v3384_v53  ;;  %v2950_v9 = vsel %vm4691_vm3, %v5951_v32, %v5937_v56  ;;  %v6021_v22 = vsel %vm4884_vm6, %v4153_v42, %v3447_v58  ;;  %v6267_v53 = vld [vmem:[#allocation8_spill] sm:$0xff] }
 0x136   : > { %v3449_v10 = vrot.slane %v3447_v58, 4  ;;  %v4145_v49 = vrot.slane %v4129_v1, 9  ;;  %v6027_v16 = vsel %vm4884_vm6, %v3386_v19, %v3387_v29  ;;  %v3391_v26 = vrot.slane %v5652_v40, 5  ;;  %v4139_v40 = vld [vmem:[%s4656_s23 + $0xc0] sm:$0xe] }
 0x137   : > { %v3394_v8 = vrot.slane %v5713_v28, 5  ;;  %v4154_v15 = vrot.slane %v4138_v0, 9  ;;  %v4163_v56 = vcombine.low %v6012_v34, %v6027_v16  ;;  %v3457_v5 = vrot.slane %v6266_v6, 5  ;;  %v6269_v0 = vld [vmem:[#allocation10_spill] sm:$0xff] }
 0x138   : > { %v6037_v32 = vsel %vm4884_vm6, %v3449_v10, %v3450_v4  ;;  %v3393_v44 = vrot.slane %v3391_v26, 4  ;;  %v4146_v39 = vrot.slane %v4130_v54, 9  ;;  %v3398_v29 = vrot.slane %v6267_v53, 5  ;;  %v4131_v19 = vld [vmem:[%s4656_s23 + $0x60] sm:$0xe] }
 0x139   : > { %v4172_v28 = vcombine.low %v6021_v22, %v6037_v32  ;;  %v4155_v58 = vrot.slane %v4139_v40, 9  ;;  %v3461_v62 = vrot.slane %v6269_v0, 5  ;;  %v4147_v40 = vrot.slane %v4131_v19, 9 }
 0x13a   : > { %4249 = vmatpush3.bf16.xpose.msra.mxu1 %v5905_v60  ;;  %v3454_v60 = vrot.slane %v5722_v55, 5  ;;  %v6054_v55 = vsel %vm4884_vm6, %v3421_v31, %v3422_v30  ;;  %v6063_v1 = vsel %vm4884_vm6, %v3393_v44, %v3394_v8  ;;  %v6076_v4 = vsel %vm4884_vm6, %v4146_v39, %v3398_v29  ;;  %v6271_v44 = vld [vmem:[#allocation12_spill] sm:$0xff] }
 0x13b   : > { %4319 = vmatpush3.bf16.xpose.msra.mxu0 %v5930_v12  ;;  %4411 = vmatprep.subr.msk.bf16.mxu1 %vm330_vm0, %v4531_v17  ;;  %v6048_v12 = vsel %vm4884_vm6, %v4145_v49, %v3391_v26  ;;  %v6268_v17 = vld [vmem:[#allocation11_spill] sm:$0xff]  ;;  %v3400_v10 = vrot.slane %v3398_v29, 4  ;;  %v6083_v26 = vsel %vm4884_vm6, %v4155_v58, %v3461_v62  ;;  %v3463_v8 = vrot.slane %v3461_v62, 4 }
 0x13c   : > { %4442 = vmatprep.subr.msk.bf16.mxu0 %vm330_vm0, %v5932_v59  ;;  %v6058_v51 = vsel %vm4884_vm6, %v4154_v15, %v3454_v60  ;;  %v3456_v59 = vrot.slane %v3454_v60, 4  ;;  %v3401_v42 = vrot.slane %v6268_v17, 5  ;;  %v4164_v30 = vcombine.low %v6048_v12, %v6063_v1  ;;  %v4140_v49 = vld [vmem:[%s4656_s23 + $0xcc] sm:$0xe]  ;;  %v6270_v60 = vld [vmem:[#allocation2_spill] sm:$0xff] }
 0x13d   : > { %v3464_v15 = vrot.slane %v5826_v50, 5  ;;  %v3426_v6 = vrot.slane %v6270_v60, 5  ;;  %v3405_v39 = vrot.slane %v6271_v44, 5  ;;  %v6272_v50 = vld [vmem:[#allocation13_spill] sm:$0xff]  ;;  %v4156_v58 = vrot.slane %v4140_v49, 9 }
 0x13e   : > { %v6072_v31 = vsel %vm4884_vm6, %v3456_v59, %v3457_v5  ;;  %v6089_v5 = vsel %vm4884_vm6, %v3400_v10, %v3401_v42  ;;  %v4132_v59 = vld [vmem:[%s4656_s23 + $0x6c] sm:$0xe]  ;;  %v3408_v17 = vrot.slane %v6272_v50, 5  ;;  %v3468_v62 = vrot.slane %v5834_v18, 5 }
 0x13f   : > { %v4173_v54 = vcombine.low %v6058_v51, %v6072_v31  ;;  %v4165_v53 = vcombine.low %v6076_v4, %v6089_v5  ;;  %v6098_v29 = vsel %vm4884_vm6, %v3463_v8, %v3464_v15  ;;  %v6106_v0 = vsel %vm4884_vm6, %v4147_v40, %v3405_v39  ;;  %v6273_v8 = vld [vmem:[#allocation14_spill] sm:$0xff] }
 0x140   : > { %v4174_v42 = vcombine.low %v6083_v26, %v6098_v29  ;;  %v4115_v19 = vcombine.low %v2940_v52, %v2950_v9  ;;  %v3471_v10 = vrot.slane %v5845_v48, 5  ;;  %v4148_v49 = vrot.slane %v4132_v59, 9 }
 0x141   : > { %v3412_v15 = vrot.slane %v6273_v8, 5  ;;  %v3469_v18 = vsel %vm4884_vm6, %v4156_v58, %v3468_v62  ;;  %v3470_v40 = vrot.slane %v3468_v62, 4  ;;  %v4168_v52 = vcombine.low %v5955_v37, %v6054_v55  ;;  %v6275_v55 = vld [vmem:[#allocation5_spill] sm:$0xff]  ;;  %v4535_v8 = vld [vmem:[%s6229_s1 + $0x40] sm:$0x3f]  }
 0x142   : > { %4251 = vmatpush3.bf16.xpose.msra.mxu1 %v5919_v63  ;;  %v3407_v63 = vrot.slane %v3405_v39, 4  ;;  %v4600_v39 = vmov 0   ;;  %v3224_v59 = vsel %vm330_vm0, %v4115_v19, 0  ;;  %v3367_v38 = vsel %vm4884_vm6, %v5974_v43, %v3366_v47 }
 0x143   : > { %4321 = vmatpush3.bf16.xpose.msra.mxu0 %v5935_v23  ;;  %v4134_v23 = vld [vmem:[%s4656_s23 + $0x84] sm:$0xe]  ;;  %v3413_v48 = vsel %vm4884_vm6, %v4148_v49, %v3412_v15  ;;  %v3414_v45 = vrot.slane %v3412_v15, 4  ;;  %v3472_v44 = vsel %vm4884_vm6, %v3470_v40, %v3471_v10  ;;  %4478 = vset.pattern.permute.xlu0 %v4600_v39  ;;  %v3429_v50 = vrot.slane %v6275_v55, 5  ;;  %v6277_v10 = vld [vmem:[#allocation4_spill] sm:$0xff]  ;;  %v6278_v40 = vld [vmem:[#allocation7_spill] sm:$0xff] }
 0x144   : > { %4443 = vmatprep.subr.msk.bf16.mxu0 %vm330_vm0, %v5945_v46  ;;  %v3409_v60 = vsel %vm4884_vm6, %v3407_v63, %v3408_v17  ;;  %v3415_v46 = vrot.slane %v5877_v36, 5  ;;  %v3364_v36 = vsel %vm4884_vm6, %v4141_v24, %v3363_v61  ;;  %v4150_v9 = vrot.slane %v4134_v23, 9  ;;  %205 = vperm.xlu0 %4478, %v197_v33   ;;  %v6274_v24 = vld [vmem:[#allocation6_spill] sm:$0xff]  ;;  %v6276_v17 = vld [vmem:[#allocation3_spill] sm:$0xff] }
 0x145   : > { %v4166_v21 = vcombine.low %v6106_v0, %v3409_v60  ;;  %v4175_v37 = vcombine.low %v3469_v18, %v3472_v44  ;;  %v3428_v61 = vrot.slane %v3426_v6, 4  ;;  %v3370_v58 = vrot.slane %v6276_v17, 5  ;;  %v4126_v63 = vld [vmem:[%s4656_s23 + $0x24] sm:$0xe] }
 0x146   : > { %v3416_v35 = vsel %vm4884_vm6, %v3414_v45, %v3415_v46  ;;  %v4160_v43 = vcombine.low %v3364_v36, %v3367_v38  ;;  %v3427_v47 = vsel %vm4884_vm6, %v4150_v9, %v3426_v6  ;;  %v4142_v19 = vrot.slane %v4126_v63, 9 }
 0x147   : > { %v4167_v0 = vcombine.low %v3413_v48, %v3416_v35  ;;  %v3430_v62 = vsel %vm4884_vm6, %v3428_v61, %v3429_v50  ;;  %v3372_v23 = vrot.slane %v3370_v58, 4  ;;  %v3373_v49 = vrot.slane %v6277_v10, 5 }
 0x148   : > { %200 = vperm.xlu0 %4478, %v196_v11   ;;  %v3533_v15 = vsel %vm330_vm0, %v4160_v43, 0  ;;  %v4169_v60 = vcombine.low %v3427_v47, %v3430_v62  ;;  %v3371_v18 = vsel %vm4884_vm6, %v4142_v19, %v3370_v58  ;;  %v3539_v7 = vsel %vm330_vm0, %v4162_v27, 0 }
 0x149   : > { %4253 = vmatmul.mubr.msk.bf16.vlgmr.msra.gmra.mrb[0].mxu1 %vm330_vm0, %v6274_v24  ;;  %v3374_v6 = vsel %vm4884_vm6, %v3372_v23, %v3373_v49  ;;  %v3542_v48 = vsel %vm330_vm0, %v4163_v56, 0  ;;  %v3545_v41 = vsel %vm330_vm0, %v4164_v30, 0  ;;  %v3548_v2 = vsel %vm330_vm0, %v4165_v53, 0 }
 0x14a   : > { %v4161_v46 = vcombine.low %v3371_v18, %v3374_v6  ;;  %v3551_v20 = vsel %vm330_vm0, %v4166_v21, 0 }
 0x14b   : > { %4323 = vmatpush3.bf16.xpose.msra.mxu0 %v3224_v59 }
 0x14c   : > { %4444 = vmatprep.subr.msk.bf16.mxu0 %vm330_vm0, %v4168_v52  ;;  %v3536_v33 = vsel %vm330_vm0, %v4161_v46, 0 }
 0x152   : > { %4325 = vmatmul.mubr.msk.bf16.vlgmr.msra.gmra.mrb[0].mxu0 %vm330_vm0, %v6278_v40 }
 0x153   : > { %4327 = vmatpush3.bf16.xpose.msra.mxu0 %v3533_v15  ;;  %4342 = vmatprep.mubr.msk.bf16.mxu0 %vm330_vm0, %v4535_v8 }
 0x154   : > { %4445 = vmatprep.subr.msk.bf16.mxu0 %vm330_vm0, %v4169_v60 }
 0x15b   : > { %4329 = vmatpush3.bf16.xpose.msra.mxu0 %v3536_v33 }
 0x15c   : > { %4446 = vmatprep.subr.msk.bf16.mxu0 %vm330_vm0, %v4170_v13  ;;  %v3554_v13 = vsel %vm330_vm0, %v4167_v0, 0 }
 0x163   : > { %4331 = vmatpush3.bf16.xpose.msra.mxu0 %v3539_v7 }
 0x164   : > { %4447 = vmatprep.subr.msk.bf16.mxu0 %vm330_vm0, %v4171_v14 }
 0x16b   : > { %4333 = vmatpush3.bf16.xpose.msra.mxu0 %v3542_v48 }
 0x16c   : > { %4448 = vmatprep.subr.msk.bf16.mxu0 %vm330_vm0, %v4172_v28 }
 0x173   : > { %4335 = vmatpush3.bf16.xpose.msra.mxu0 %v3545_v41 }
 0x174   : > { %4449 = vmatprep.subr.msk.bf16.mxu0 %vm330_vm0, %v4173_v54 }
 0x17b   : > { %4337 = vmatpush3.bf16.xpose.msra.mxu0 %v3548_v2 }
 0x17c   : > { %4450 = vmatprep.subr.msk.bf16.mxu0 %vm330_vm0, %v4174_v42 }
 0x183   : > { %4339 = vmatpush3.bf16.xpose.msra.mxu0 %v3551_v20 }
 0x184   : > { %4451 = vmatprep.subr.msk.bf16.mxu0 %vm330_vm0, %v4175_v37 }
 0x18b   : > { %4341 = vmatpush3.bf16.xpose.msra.mxu0 %v3554_v13 }
 0x192   : > { %4343 = vmatmul.mubr.msk.bf16.vlgmr.msra.gmra.mrb[0].mxu0 %vm330_vm0, %v4535_v8 }
 0x1c3   : > { %v206_v14 = vpop.permute.xlu0 %205 }
 0x1c7   : > { %v201_v34 = vpop.permute.xlu0 %200 }
 0x21c   : > { %v1560_v57 = vpop.f32.mrb[0].mxu1 }
 0x21d   : > { %v1562_v3 = vpop.f32.mrb[1].mxu1  ;;  %v4344_v22 = vadd.f32 %v1560_v57, %v201_v34 }
 0x21e   : > { %v1564_v27 = vpop.f32.mrb[2].mxu1  ;;  %v4346_v16 = vadd.f32 %v1562_v3, %v201_v34 }
 0x21f   : > { %v1566_v25 = vpop.f32.mrb[3].mxu1  ;;  %v4348_v32 = vadd.f32 %v1564_v27, %v206_v14 }
 0x220   : > { %v4350_v51 = vadd.f32 %v1566_v25, %v206_v14 }
 0x265   : > { %v3614_v56 = vpop.f32.mrb[0].mxu0 }
 0x266   : > { %v4345_v28 = vadd.f32 %v4344_v22, %v3614_v56  ;;  %v3616_v12 = vpop.f32.mrb[1].mxu0 }
 0x267   : > { %v4347_v1 = vadd.f32 %v4346_v16, %v3616_v12  ;;  %v3618_v30 = vpop.f32.mrb[2].mxu0 }
 0x268   : > { %v4349_v31 = vadd.f32 %v4348_v32, %v3618_v30  ;;  %v3620_v4 = vpop.f32.mrb[3].mxu0 }
 0x269   : > { %v4351_v54 = vadd.f32 %v4350_v51, %v3620_v4 }
 0x26a   : > { %v4177_v26 = vmul.f32 -1.442695, %v4349_v31 }
 0x26b   : > { %v4178_v5 = vmul.f32 -1.442695, %v4351_v54 }
 0x26c   : > { %4536 = vpow2.f32 %v4177_v26 }
 0x26d   : > { %4538 = vpow2.f32 %v4178_v5 }
 0x276   : > { %v4537_v53 = vpop.eup %4536 }
 0x277   : > { %v4539_v29 = vpop.eup %4538  ;;  %v3633_v42 = vadd.f32 1.0, %v4537_v53 }
 0x278   : > { %v3634_v21 = vadd.f32 1.0, %v4539_v29 }
 0x279   : > { %4540 = vrcp.f32 %v3633_v42 }
 0x27a   : > { %4542 = vrcp.f32 %v3634_v21 }
 0x283   : > { %v4541_v45 = vpop.eup %4540 }
 0x284   : > { %v4543_v52 = vpop.eup %4542  ;;  %v3641_v36 = vrot.slane %v4541_v45, 4 }
 0x285   : > { %v3642_v9 = vrot.slane %v4543_v52, 4 }
 0x286   : > { %v3645_v44 = vmul.f32 %v4345_v28, %v3641_v36 }
 0x287   : > { %v3646_v39 = vmul.f32 %v4347_v1, %v3642_v9 }
 0x288   : > { %v3649_v59 = vrot.slane %v3645_v44, 4 }
 0x289   : > { %v3650_v38 = vrot.slane %v3646_v39, 4 }
 0x28a   : > { %v3653_v37 = vadd.f32 %v4345_v28, %v3649_v59 }
 0x28b   : > { %v3654_v35 = vadd.f32 %v4347_v1, %v3650_v38 }
 0x28d   : > { %v3657_v24 = vcombine.low %v3653_v37, %v3654_v35 }
 0x28f   : > { %3659 = vst [vmem:[%s192_s24] sm:$0xff] %v3657_v24 }
 0x290 PF: > { %s13_s14 = sadd.s32 1, %s4598_s14   ;;  %s6279_s12 = smov %s4594_s13 }
 0x291   : > { %p10_p5 = scmp.ge.s32.totalorder %s13_s14, 4   ;;  %s6280_s13 = smov %s6282_s15 }
 0x293   :  { %12 = sbr.rel (!%p10_p5) target bundleno = 2 (0x2), region = 73 }

</bundles_post_ra>
